<compile_context>
chip_gen: v5e
topology: v5e:2x2
jax: 0.10.0
libtpu: 0.0.40
codegen_flags: <defaults>
</compile_context>

<pallas_src>
import numpy as np
import jax
import jax.numpy as jnp
from jax.scipy.linalg import block_diag
from jax.experimental import pallas as pl
from jax.experimental.pallas import tpu as pltpu


def _round_up(x, m):
    return (x + m - 1) // m * m


# --------------------- MADE mask construction (parameter setup, plain numpy) ---------------------
def build_made_masks(in_dim, hidden_dims, out_dim, reverse_ordering):
    """Connectivity masks as in stribor.net.MADE.update_masks (natural_ordering=True, seed=0)."""
    L = len(hidden_dims)
    rng = np.random.RandomState(0)
    m = {}
    m[-1] = np.arange(in_dim)
    if reverse_ordering:
        m[-1] = m[-1][::-1]
    for l in range(L):
        m[l] = rng.randint(m[l - 1].min(), in_dim - 1, size=hidden_dims[l])
    masks = [(m[l - 1][:, None] <= m[l][None, :]) for l in range(L)]
    masks.append(m[L - 1][:, None] < m[-1][None, :])
    if out_dim > in_dim:
        k = out_dim // in_dim
        masks[-1] = np.concatenate([masks[-1]] * k, axis=1)
    return [jnp.asarray(mk.astype(np.float32)) for mk in masks]


def init_made_params(key, in_dim, hidden_dims, out_dim, reverse_ordering):
    """Deterministic nn.Linear-style init; MADE mask folded into the weight."""
    masks = build_made_masks(in_dim, hidden_dims, out_dim, reverse_ordering)
    dims = [in_dim] + list(hidden_dims) + [out_dim]
    params = []
    for li, (d_in, d_out) in enumerate(zip(dims[:-1], dims[1:])):
        key, kw, kb = jax.random.split(key, 3)
        bound = 1.0 / float(np.sqrt(d_in))
        w = jax.random.uniform(kw, (d_in, d_out), jnp.float32, -bound, bound)
        b = jax.random.uniform(kb, (1, d_out), jnp.float32, -bound, bound)
        params += [w * masks[li], b]  # masked weight (fan_in, fan_out), bias (1, fan_out)
    return params


# -------------------- fuse the two MADE nets into a single MLP (setup-time only) --------------------
def fuse_made_params(params1, params2, in_dim, out_dim):
    """Fold net1 + net2 into one MLP and fold the per-dim output transpose into the last layer."""
    assert out_dim % in_dim == 0
    k = out_dim // in_dim
    n = len(params1) // 2
    fused = []
    for li in range(n):
        w1, b1 = params1[2 * li], params1[2 * li + 1]
        w2, b2 = params2[2 * li], params2[2 * li + 1]
        if n == 1:                       # degenerate: single linear layer is both first and last
            w, b = w1 + w2, b1 + b2
        elif li == 0:                    # first layer: widen outputs
            w = jnp.concatenate([w1, w2], axis=1)
            b = jnp.concatenate([b1, b2], axis=1)
        elif li < n - 1:                 # middle layers: block-diagonal (nets stay independent)
            w = block_diag(w1, w2)
            b = jnp.concatenate([b1, b2], axis=1)
        else:                            # last layer: stack inputs, sum biases (= net1 + net2)
            w = jnp.concatenate([w1, w2], axis=0)
            b = b1 + b2
        fused += [w, b]

    # Fold the MADE return_per_dim transpose + flatten: raw col (j*in_dim + d) -> final (d*k + j).
    perm = np.arange(out_dim).reshape(k, in_dim).T.reshape(-1)
    fused[-2] = fused[-2][:, perm]
    fused[-1] = fused[-1][:, perm]
    return fused


# -------------------- row packing (lane densification) + bias slab (setup-time only) --------------------
def choose_row_pack(fused_params, batch_hint=None, target=32, weight_budget_bytes=8 << 20):
    """Rows packed per tile row.  Bounded by batch and by total packed-weight bytes (R^2 growth)."""
    shapes = [fused_params[2 * i].shape for i in range(len(fused_params) // 2)]
    r = target
    if batch_hint is not None:
        r = min(r, max(1, int(batch_hint)))
    if r >= 8:
        r = (r // 8) * 8               # keep packed fan-ins sublane-aligned
    while r > 1 and sum(4 * r * r * a * b for a, b in shapes) > weight_budget_bytes:
        r = max(1, r // 2)
    return r


def row_pack_params(fused_params, r):
    """Replicate each fused layer block-diagonally r times; tile biases r times."""
    packed_w, packed_b = [], []
    for i in range(len(fused_params) // 2):
        w, b = fused_params[2 * i], fused_params[2 * i + 1]
        if r == 1:
            packed_w.append(w)
            packed_b.append(b)
        else:
            packed_w.append(block_diag(*([w] * r)))
            packed_b.append(jnp.tile(b, (1, r)))
    return packed_w, packed_b


def build_bias_slab(packed_b):
    """All biases in one (1, total) slab; segments start at 128-aligned columns."""
    segments, total = [], 0
    for b in packed_b:
        width = b.shape[1]
        segments.append((total, width))
        total += _round_up(width, 128)
    slab = jnp.zeros((1, total), jnp.float32)
    for (off, width), b in zip(segments, packed_b):
        slab = slab.at[0, off:off + width].set(b[0])
    return slab, segments


# -------------------------------------- hardware queries --------------------------------------
def _num_tensorcores():
    """Best-effort TensorCores-per-device (v7x / v4 / v5p megacore = 2, v5e / v6e = 1)."""
    try:
        info = pltpu.get_tpu_info()
        for name in ("num_tensorcores", "tensorcore_count", "num_cores", "core_count"):
            v = getattr(info, name, None)
            if isinstance(v, int) and v >= 1:
                return v
    except Exception:
        pass
    try:
        kind = jax.devices()[0].device_kind.lower()
        if ("v7" in kind) or ("v4" in kind) or ("v5p" in kind):
            return 2
    except Exception:
        pass
    return 1


def _vmem_limit_bytes():
    """Explicit scoped-VMEM limit: 3/4 of physical, capped at 96 MiB (v7x physical is 64 MiB)."""
    cap = 64 << 20
    try:
        cap = int(pltpu.get_tpu_info().vmem_capacity_bytes)
    except Exception:
        pass
    return int(min(cap * 3 // 4, 96 << 20))


# -------------------------------------- Pallas kernel --------------------------------------
def make_fused_kernel(num_linear, bias_segments):
    """One fused, row-packed MLP (masked-MADE sum, output already permuted) on one batch tile."""

    def kernel(*refs):
        x_ref = refs[0]
        w_refs = refs[1:1 + num_linear]
        b_ref = refs[1 + num_linear]
        y_ref = refs[2 + num_linear]

        h = x_ref[...]
        for li in range(num_linear):
            off, width = bias_segments[li]
            w = w_refs[li][...]
            b = b_ref[0:1, off:off + width]          # static, 128-aligned slab slice
            h = jnp.dot(h, w, preferred_element_type=jnp.float32) + b
            if li < num_linear - 1:                  # ReLU between layers, none after the last
                h = jnp.maximum(h, 0.0)
        y_ref[...] = h.astype(y_ref.dtype)

    return kernel


# -------------------------------------- batch tiling --------------------------------------
def _pick_batch_tile(bp, row_bytes, num_cores, tile_budget_bytes, max_rows_cap=2048):
    """Packed rows per grid step.  1 TC: single big tile.  2 TC: even, balanced step count."""
    max_rows = int(tile_budget_bytes // max(row_bytes, 1))
    max_rows = max(8, min(max_rows_cap, (max_rows // 8) * 8))
    if num_cores > 1 and bp >= 16:
        steps = max(2, -(-bp // max_rows))
        if steps % 2:
            steps += 1                  # even step count so both TensorCores get equal work
        tb = -(-bp // steps)
        tb = ((tb + 7) // 8) * 8        # sublane multiple (legal non-full block)
        return max(1, min(tb, bp))
    return max(1, min(bp, max_rows))    # single-TC: no forced split, fewer pipeline steps


# -------------------------------------- forward --------------------------------------
def diffeq_zero_trace_forward(t, x, packed_weights, bias_slab, bias_segments, r, out_dim):
    """Forward of DiffeqZeroTraceMLP.  `t` is accepted but unused (matches the PyTorch forward)."""
    del t
    B, D = x.shape
    num_linear = len(packed_weights)
    in_w, out_w = r * D, r * out_dim

    # Row packing: free row-major views (plus a tiny zero-pad when r does not divide B).
    b_pad = _round_up(B, r)
    xp = x if b_pad == B else jnp.pad(x, ((0, b_pad - B), (0, 0)))
    bp = b_pad // r
    xp = xp.reshape(bp, in_w)

    num_cores = _num_tensorcores()
    vmem_limit = _vmem_limit_bytes()
    param_bytes = 4 * (sum(int(np.prod(w.shape)) for w in packed_weights)
                       + int(np.prod(bias_slab.shape)))
    max_width = max([in_w, out_w] + [w.shape[1] for w in packed_weights])
    row_bytes = 4 * (2 * (in_w + out_w) + 2 * max_width)           # I/O double-buffers + activations
    tile_budget = max(1 << 20, vmem_limit - 2 * param_bytes - (8 << 20))
    tb = _pick_batch_tile(bp, row_bytes, num_cores, tile_budget)
    grid = (pl.cdiv(bp, tb),)

    in_specs = ([pl.BlockSpec((tb, in_w), lambda i: (i, 0))]
                # Params are grid-invariant (constant index map) -> no re-DMA per step.
                + [pl.BlockSpec(w.shape, lambda i: (0, 0)) for w in packed_weights]
                + [pl.BlockSpec(bias_slab.shape, lambda i: (0, 0))])

    # Note: when tb does not divide bp, the ragged last step computes on OOB-padded rows; this
    # is safe because every op is row-independent and the output write is bounds-masked.
    y = pl.pallas_call(
        make_fused_kernel(num_linear, bias_segments),
        out_shape=jax.ShapeDtypeStruct((bp, out_w), x.dtype),
        grid_spec=pltpu.PrefetchScalarGridSpec(
            num_scalar_prefetch=0,
            grid=grid,
            in_specs=in_specs,
            out_specs=pl.BlockSpec((tb, out_w), lambda i: (i, 0)),
        ),
        compiler_params=pltpu.CompilerParams(
            dimension_semantics=("parallel",),
            vmem_limit_bytes=vmem_limit,
        ),
    )(xp, *packed_weights, bias_slab)

    y = y.reshape(b_pad, out_dim)[:B]
    # Log-Jacobian diagonal of a zero-trace MADE flow is exactly zero; produced by the wrapper
    # instead of being written/DMA'd out of the kernel.
    return y, jnp.zeros_like(x)


# ----------------------------------- plain-JAX reference -----------------------------------
def made_forward_ref(x, params):
    h = x
    n = len(params) // 2
    for li in range(n):
        h = h @ params[2 * li] + params[2 * li + 1]
        if li < n - 1:
            h = jax.nn.relu(h)
    return h


def reference_forward(x, params1, params2, in_dim, out_dim):
    B = x.shape[0]
    k = out_dim // in_dim
    y = made_forward_ref(x, params1) + made_forward_ref(x, params2)
    return y.reshape(B, k, in_dim).transpose(0, 2, 1).reshape(B, in_dim * k)


# ------------------------------------------ tests ------------------------------------------
def _run_case(key, batch, in_dim, hidden_dims, out_dim):
    kp1, kp2, kx, kt = jax.random.split(key, 4)
    params1 = init_made_params(kp1, in_dim, hidden_dims, out_dim, reverse_ordering=False)
    params2 = init_made_params(kp2, in_dim, hidden_dims, out_dim, reverse_ordering=True)
    fused = fuse_made_params(params1, params2, in_dim, out_dim)

    r = choose_row_pack(fused, batch_hint=batch)
    packed_w, packed_b = row_pack_params(fused, r)
    bias_slab, bias_segments = build_bias_slab(packed_b)

    x = jax.random.normal(kx, (batch, in_dim), jnp.float32)
    t = jax.random.uniform(kt, (batch, 1), jnp.float32)   # ignored by forward, as in PyTorch

    y, ldj = diffeq_zero_trace_forward(t, x, packed_w, bias_slab, bias_segments, r, out_dim)
    jax.block_until_ready((y, ldj))

    y_ref = reference_forward(x, params1, params2, in_dim, out_dim)
    assert y.shape == (batch, out_dim) and ldj.shape == x.shape
    err = float(jnp.max(jnp.abs(y - y_ref)))
    assert jnp.allclose(y, y_ref, atol=5e-5, rtol=5e-5), err
    assert bool(jnp.all(ldj == 0))


if __name__ == "__main__":
    key = jax.random.PRNGKey(0)
    k1, k2, k3 = jax.random.split(key, 3)

    # Case 1: k=2 output expansion, single hidden layer; R=32 row packing -> lane widths 128/256.
    _run_case(k1, batch=256, in_dim=4, hidden_dims=[32], out_dim=8)

    # Case 2: k=1, two hidden layers (block-diag fusion), odd batch (exercises batch padding).
    _run_case(k2, batch=10, in_dim=3, hidden_dims=[24, 24], out_dim=3)

    # Case 3: larger batch -> multi-row packed grid (single step on 1-TC, even split on 2-TC).
    _run_case(k3, batch=2048, in_dim=4, hidden_dims=[64], out_dim=8)

    print("KERNEL_OK")
</pallas_src>

<mosaic_0001>
module attributes {stable_mosaic.version = 11 : i64} {
  func.func @kernel(%arg0: i32, %arg1: memref<8x128xf32, #tpu.memory_space<vmem>>, %arg2: memref<128x2048xf32, #tpu.memory_space<vmem>>, %arg3: memref<2048x256xf32, #tpu.memory_space<vmem>>, %arg4: memref<1x2304xf32, #tpu.memory_space<vmem>>, %arg5: memref<8x256xf32, #tpu.memory_space<vmem>>) attributes {dimension_semantics = [#tpu.dimension_semantics<parallel>], iteration_bounds = array<i64: 1>, scalar_prefetch = 0 : i64, scratch_operands = 0 : i64, tpu.core_type = #tpu.core_type<tc>, window_params = [{transform_indices = @transform_0, window_bounds = array<i64: 8, 128>}, {pipeline_mode = #tpu.pipeline_mode<synchronous>, transform_indices = @transform_1, window_bounds = array<i64: 128, 2048>}, {pipeline_mode = #tpu.pipeline_mode<synchronous>, transform_indices = @transform_2, window_bounds = array<i64: 2048, 256>}, {pipeline_mode = #tpu.pipeline_mode<synchronous>, transform_indices = @transform_3, window_bounds = array<i64: 1, 2304>}, {transform_indices = @transform_4, window_bounds = array<i64: 8, 256>}]} {
    %c0 = arith.constant 0 : index
    %c0_0 = arith.constant 0 : index
    %0 = vector.load %arg1[%c0, %c0_0] : memref<8x128xf32, #tpu.memory_space<vmem>>, vector<8x128xf32>
    %c0_1 = arith.constant 0 : index
    %c0_2 = arith.constant 0 : index
    %1 = vector.load %arg2[%c0_1, %c0_2] : memref<128x2048xf32, #tpu.memory_space<vmem>>, vector<128x2048xf32>
    %c0_3 = arith.constant 0 : index
    %c0_4 = arith.constant 0 : index
    %2 = vector.load %arg4[%c0_3, %c0_4] : memref<1x2304xf32, #tpu.memory_space<vmem>>, vector<1x2048xf32>
    %cst = arith.constant dense<0.000000e+00> : vector<8x2048xf32>
    %3 = tpu.matmul %0, %1, %cst {dimension_numbers = #tpu.dot_dimension_numbers<[1], [0], [0], [1], [0, 0, 1, 1], [], []>} : vector<8x128xf32>, vector<128x2048xf32>, vector<8x2048xf32> -> vector<8x2048xf32>
    %4 = vector.broadcast %2 : vector<1x2048xf32> to vector<8x2048xf32>
    %5 = arith.addf %3, %4 : vector<8x2048xf32>
    %cst_5 = arith.constant 0.000000e+00 : f32
    %6 = vector.broadcast %cst_5 : f32 to vector<8x2048xf32>
    %7 = arith.maximumf %5, %6 : vector<8x2048xf32>
    %c0_6 = arith.constant 0 : index
    %c0_7 = arith.constant 0 : index
    %8 = vector.load %arg3[%c0_6, %c0_7] : memref<2048x256xf32, #tpu.memory_space<vmem>>, vector<2048x256xf32>
    %c0_8 = arith.constant 0 : index
    %c2048 = arith.constant 2048 : index
    %9 = vector.load %arg4[%c0_8, %c2048] : memref<1x2304xf32, #tpu.memory_space<vmem>>, vector<1x256xf32>
    %cst_9 = arith.constant dense<0.000000e+00> : vector<8x256xf32>
    %10 = tpu.matmul %7, %8, %cst_9 {dimension_numbers = #tpu.dot_dimension_numbers<[1], [0], [0], [1], [0, 0, 1, 1], [], []>} : vector<8x2048xf32>, vector<2048x256xf32>, vector<8x256xf32> -> vector<8x256xf32>
    %11 = vector.broadcast %9 : vector<1x256xf32> to vector<8x256xf32>
    %12 = arith.addf %10, %11 : vector<8x256xf32>
    %c0_10 = arith.constant 0 : index
    %c0_11 = arith.constant 0 : index
    %13 = vector.load %arg5[%c0_10, %c0_11] : memref<8x256xf32, #tpu.memory_space<vmem>>, vector<8x256xf32>
    tpu.vector_store %arg5[%c0_10, %c0_11], %12 {strides = array<i32>} : memref<8x256xf32, #tpu.memory_space<vmem>>, vector<8x256xf32>,
    return
  }
  func.func @transform_0(%arg0: i32) -> (i32, i32) {
    %c0_i32 = arith.constant 0 : i32
    %c0_i32_0 = arith.constant 0 : i32
    return %arg0, %c0_i32 : i32, i32
  }
  func.func @transform_1(%arg0: i32) -> (i32, i32) {
    %c0_i32 = arith.constant 0 : i32
    %c0_i32_0 = arith.constant 0 : i32
    %c0_i32_1 = arith.constant 0 : i32
    return %c0_i32, %c0_i32_0 : i32, i32
  }
  func.func @transform_2(%arg0: i32) -> (i32, i32) {
    %c0_i32 = arith.constant 0 : i32
    %c0_i32_0 = arith.constant 0 : i32
    %c0_i32_1 = arith.constant 0 : i32
    return %c0_i32, %c0_i32_0 : i32, i32
  }
  func.func @transform_3(%arg0: i32) -> (i32, i32) {
    %c0_i32 = arith.constant 0 : i32
    %c0_i32_0 = arith.constant 0 : i32
    %c0_i32_1 = arith.constant 0 : i32
    return %c0_i32, %c0_i32_0 : i32, i32
  }
  func.func @transform_4(%arg0: i32) -> (i32, i32) {
    %c0_i32 = arith.constant 0 : i32
    %c0_i32_0 = arith.constant 0 : i32
    return %arg0, %c0_i32 : i32, i32
  }
}

</mosaic_0001>

<bundles_post_ra>
// kernel: tpu_custom_call.1
= control target key start
LH: loop header
LB: loop body
LE: loop exit
PB: predicated region body
PF: predicated region fallthrough
CT: control target
= control target key end

     0   :  { %9 = vsyncpa [#allocation3], 0  ;;  %s2225_s0 = inlined_call_operand.hbm [shape: f32[8,128], index: 0, kind: input, shape index: {}]   ;;  %s2226_s1 = inlined_call_operand.hbm [shape: f32[128,2048], index: 1, kind: input, shape index: {}]   ;;  %s2227_s2 = inlined_call_operand.hbm [shape: f32[2048,256], index: 2, kind: input, shape index: {}]   ;;  %s2228_s3 = inlined_call_operand.hbm [shape: f32[1,2304], index: 3, kind: input, shape index: {}]   ;;  %s2229_s4 = inlined_call_operand.hbm [shape: f32[8,256], index: 4, kind: output, shape index: {}]  }
   0x1   :  { %10 = vsyncpa [#allocation6], 0 }
   0x2   :  { %11 = vsyncpa [#allocation9], 0  ;;  %s28_s17 = sshll.u32 %s2226_s1, 4  ;;  %s29_s17 = int_to_ptr.hbm [resolvable:$true] %s28_s17 }
   0x3   :  { %12 = vsyncpa [#allocation4], 0  ;;  %s2022_s18 = smov [#allocation5]   ;;  %s18_s22 = sshll.u32 %s2225_s0, 4  ;;  %s19_s22 = int_to_ptr.hbm [resolvable:$true] %s18_s22 }
   0x4   :  { %s30_s19 = sshll.u32 %s2022_s18, 4  ;;  %s2023_s23 = smov 2048   ;;  %s31_s19 = int_to_ptr.vmem [resolvable:$true] %s30_s19 }
   0x5   :  { %s2024_s24 = smov 128   ;;  %s2025_s25 = smov [#allocation2]  }
   0x6   :  { %36 = dma.hbm_to_vmem [thread:$0]  %s29_s17, 32768, %s31_s19, [#allocation6], %s2023_s23, %s2023_s23, %s2024_s24  }
   0x7   :  { %s20_s26 = sshll.u32 %s2025_s25, 4  ;;  %s41_s29 = sshll.u32 %s2227_s2, 4  ;;  %s21_s26 = int_to_ptr.vmem [resolvable:$true] %s20_s26  ;;  %s42_s29 = int_to_ptr.hbm [resolvable:$true] %s41_s29 }
   0x8   :  { %23 = dma.hbm_to_vmem [thread:$0]  %s19_s22, 128, %s21_s26, [#allocation3]  }
   0x9   :  { %s2026_s1 = smov [#allocation7]   ;;  %s55_s0 = sshll.u32 %s2228_s3, 4  ;;  %s56_s0 = int_to_ptr.hbm [resolvable:$true] %s55_s0 }
   0xa   :  { %s43_s30 = sshll.u32 %s2026_s1, 4  ;;  %s2027_s7 = smov 256   ;;  %s44_s30 = int_to_ptr.vmem [resolvable:$true] %s43_s30 }
   0xb   :  { %s2028_s8 = smov 16   ;;  %s2029_s9 = smov [#allocation8]  }
   0xc   :  { %49 = dma.hbm_to_vmem [thread:$0]  %s42_s29, 65536, %s44_s30, [#allocation6], %s2027_s7, %s2027_s7, %s2028_s8  }
   0xd   :  { %s57_s10 = sshll.u32 %s2029_s9, 4  ;;  %s58_s10 = int_to_ptr.vmem [resolvable:$true] %s57_s10 }
   0xe   :  { %60 = dma.hbm_to_vmem [thread:$0]  %s56_s0, 288, %s58_s10, [#allocation9]  }
   0xf   :  { %2014 = dma.done.wait [#allocation3], 128  }
  0x10   :  { %2015 = vsyncadd [#allocation3], 4294967168 }
  0x11   :  { %2016 = dma.done.wait [#allocation6], 98304  }
  0x12   :  { %2017 = vsyncadd [#allocation6], 4294868992 }
  0x13   :  { %2018 = dma.done.wait [#allocation9], 288  }
  0x14   :  { %2019 = vsyncadd [#allocation9], 4294967008  ;;  %v318_v0 = vld [vmem:[#allocation5 + $0x780] sm:$0xff]  ;;  %v319_v1 = vld [vmem:[#allocation5 + $0x788] sm:$0xff]  ;;  %s2030_s2 = smov [#allocation10]   ;;  %s1873_s13 = sshll.u32 %s2229_s4, 4  ;;  %s1874_s13 = int_to_ptr.hbm [resolvable:$true] %s1873_s13 }
  0x15   :  { %v320_v2 = vld [vmem:[#allocation5 + $0x790] sm:$0xff]  ;;  %370 = vmatpush.msra.mxu0 %v318_v0  ;;  %390 = vmatpush.msra.mxu1 %v319_v1  ;;  %v321_v3 = vld [vmem:[#allocation5 + $0x798] sm:$0xff]  ;;  %v302_v4 = vld [vmem:[#allocation5 + $0x700] sm:$0xff]  ;;  %s1871_s3 = sshll.u32 %s2030_s2, 4  ;;  %s1872_s3 = int_to_ptr.vmem [resolvable:$true] %s1871_s3 }
  0x16   :  { %v303_v5 = vld [vmem:[#allocation5 + $0x708] sm:$0xff]  ;;  %410 = vmatpush.msra.mxu2 %v320_v2  ;;  %430 = vmatpush.msra.mxu3 %v321_v3  ;;  %v304_v6 = vld [vmem:[#allocation5 + $0x710] sm:$0xff]  ;;  %v305_v7 = vld [vmem:[#allocation5 + $0x718] sm:$0xff] }
  0x17   :  { %v286_v8 = vld [vmem:[#allocation5 + $0x680] sm:$0xff]  ;;  %371 = vmatpush.msra.mxu0 %v302_v4  ;;  %391 = vmatpush.msra.mxu1 %v303_v5  ;;  %v287_v9 = vld [vmem:[#allocation5 + $0x688] sm:$0xff]  ;;  %v288_v10 = vld [vmem:[#allocation5 + $0x690] sm:$0xff] }
  0x18   :  { %v289_v11 = vld [vmem:[#allocation5 + $0x698] sm:$0xff]  ;;  %411 = vmatpush.msra.mxu2 %v304_v6  ;;  %431 = vmatpush.msra.mxu3 %v305_v7  ;;  %v270_v12 = vld [vmem:[#allocation5 + $0x600] sm:$0xff]  ;;  %v271_v13 = vld [vmem:[#allocation5 + $0x608] sm:$0xff] }
  0x19   :  { %372 = vmatpush.msra.mxu0 %v286_v8  ;;  %392 = vmatpush.msra.mxu1 %v287_v9  ;;  %v272_v14 = vld [vmem:[#allocation5 + $0x610] sm:$0xff]  ;;  %v273_v15 = vld [vmem:[#allocation5 + $0x618] sm:$0xff]  ;;  %v254_v16 = vld [vmem:[#allocation5 + $0x580] sm:$0xff] }
  0x1a   :  { %412 = vmatpush.msra.mxu2 %v288_v10  ;;  %432 = vmatpush.msra.mxu3 %v289_v11  ;;  %v255_v17 = vld [vmem:[#allocation5 + $0x588] sm:$0xff]  ;;  %v256_v18 = vld [vmem:[#allocation5 + $0x590] sm:$0xff]  ;;  %v257_v19 = vld [vmem:[#allocation5 + $0x598] sm:$0xff] }
  0x1b   :  { %373 = vmatpush.msra.mxu0 %v270_v12  ;;  %393 = vmatpush.msra.mxu1 %v271_v13  ;;  %v238_v20 = vld [vmem:[#allocation5 + $0x500] sm:$0xff]  ;;  %v239_v21 = vld [vmem:[#allocation5 + $0x508] sm:$0xff]  ;;  %v240_v22 = vld [vmem:[#allocation5 + $0x510] sm:$0xff] }
  0x1c   :  { %413 = vmatpush.msra.mxu2 %v272_v14  ;;  %433 = vmatpush.msra.mxu3 %v273_v15  ;;  %v241_v23 = vld [vmem:[#allocation5 + $0x518] sm:$0xff]  ;;  %v222_v24 = vld [vmem:[#allocation5 + $0x480] sm:$0xff]  ;;  %v223_v25 = vld [vmem:[#allocation5 + $0x488] sm:$0xff] }
  0x1d   :  { %374 = vmatpush.msra.mxu0 %v254_v16  ;;  %394 = vmatpush.msra.mxu1 %v255_v17  ;;  %v224_v26 = vld [vmem:[#allocation5 + $0x490] sm:$0xff]  ;;  %v225_v27 = vld [vmem:[#allocation5 + $0x498] sm:$0xff]  ;;  %v206_v28 = vld [vmem:[#allocation5 + $0x400] sm:$0xff] }
  0x1e   :  { %414 = vmatpush.msra.mxu2 %v256_v18  ;;  %434 = vmatpush.msra.mxu3 %v257_v19  ;;  %v207_v29 = vld [vmem:[#allocation5 + $0x408] sm:$0xff]  ;;  %v208_v30 = vld [vmem:[#allocation5 + $0x410] sm:$0xff]  ;;  %v209_v31 = vld [vmem:[#allocation5 + $0x418] sm:$0xff] }
  0x1f   :  { %375 = vmatpush.msra.mxu0 %v238_v20  ;;  %395 = vmatpush.msra.mxu1 %v239_v21  ;;  %v190_v32 = vld [vmem:[#allocation5 + $0x380] sm:$0xff]  ;;  %v191_v33 = vld [vmem:[#allocation5 + $0x388] sm:$0xff]  ;;  %v192_v34 = vld [vmem:[#allocation5 + $0x390] sm:$0xff] }
  0x20   :  { %415 = vmatpush.msra.mxu2 %v240_v22  ;;  %435 = vmatpush.msra.mxu3 %v241_v23  ;;  %v193_v35 = vld [vmem:[#allocation5 + $0x398] sm:$0xff]  ;;  %v174_v36 = vld [vmem:[#allocation5 + $0x300] sm:$0xff]  ;;  %v175_v37 = vld [vmem:[#allocation5 + $0x308] sm:$0xff] }
  0x21   :  { %376 = vmatpush.msra.mxu0 %v222_v24  ;;  %396 = vmatpush.msra.mxu1 %v223_v25  ;;  %v176_v38 = vld [vmem:[#allocation5 + $0x310] sm:$0xff]  ;;  %v177_v39 = vld [vmem:[#allocation5 + $0x318] sm:$0xff]  ;;  %v158_v40 = vld [vmem:[#allocation5 + $0x280] sm:$0xff] }
  0x22   :  { %416 = vmatpush.msra.mxu2 %v224_v26  ;;  %436 = vmatpush.msra.mxu3 %v225_v27  ;;  %v159_v41 = vld [vmem:[#allocation5 + $0x288] sm:$0xff]  ;;  %v160_v42 = vld [vmem:[#allocation5 + $0x290] sm:$0xff]  ;;  %v161_v43 = vld [vmem:[#allocation5 + $0x298] sm:$0xff] }
  0x23   :  { %377 = vmatpush.msra.mxu0 %v206_v28  ;;  %397 = vmatpush.msra.mxu1 %v207_v29  ;;  %v142_v44 = vld [vmem:[#allocation5 + $0x200] sm:$0xff]  ;;  %v143_v45 = vld [vmem:[#allocation5 + $0x208] sm:$0xff]  ;;  %v144_v46 = vld [vmem:[#allocation5 + $0x210] sm:$0xff] }
  0x24   :  { %417 = vmatpush.msra.mxu2 %v208_v30  ;;  %437 = vmatpush.msra.mxu3 %v209_v31  ;;  %v145_v47 = vld [vmem:[#allocation5 + $0x218] sm:$0xff]  ;;  %v126_v48 = vld [vmem:[#allocation5 + $0x180] sm:$0xff]  ;;  %v127_v49 = vld [vmem:[#allocation5 + $0x188] sm:$0xff] }
  0x25   :  { %378 = vmatpush.msra.mxu0 %v190_v32  ;;  %398 = vmatpush.msra.mxu1 %v191_v33  ;;  %v128_v50 = vld [vmem:[#allocation5 + $0x190] sm:$0xff]  ;;  %v129_v51 = vld [vmem:[#allocation5 + $0x198] sm:$0xff]  ;;  %v110_v52 = vld [vmem:[#allocation5 + $0x100] sm:$0xff] }
  0x26   :  { %418 = vmatpush.msra.mxu2 %v192_v34  ;;  %438 = vmatpush.msra.mxu3 %v193_v35  ;;  %v111_v53 = vld [vmem:[#allocation5 + $0x108] sm:$0xff]  ;;  %v112_v54 = vld [vmem:[#allocation5 + $0x110] sm:$0xff]  ;;  %v113_v55 = vld [vmem:[#allocation5 + $0x118] sm:$0xff] }
  0x27   :  { %379 = vmatpush.msra.mxu0 %v174_v36  ;;  %399 = vmatpush.msra.mxu1 %v175_v37  ;;  %v94_v56 = vld [vmem:[#allocation5 + $0x80] sm:$0xff]  ;;  %v95_v57 = vld [vmem:[#allocation5 + $0x88] sm:$0xff]  ;;  %v96_v58 = vld [vmem:[#allocation5 + $0x90] sm:$0xff] }
  0x28   :  { %419 = vmatpush.msra.mxu2 %v176_v38  ;;  %439 = vmatpush.msra.mxu3 %v177_v39  ;;  %v97_v59 = vld [vmem:[#allocation5 + $0x98] sm:$0xff]  ;;  %v78_v60 = vld [vmem:[#allocation5] sm:$0xff]  ;;  %v79_v61 = vld [vmem:[#allocation5 + $0x8] sm:$0xff] }
  0x29   :  { %380 = vmatpush.msra.mxu0 %v158_v40  ;;  %400 = vmatpush.msra.mxu1 %v159_v41  ;;  %v80_v62 = vld [vmem:[#allocation5 + $0x10] sm:$0xff]  ;;  %v81_v63 = vld [vmem:[#allocation5 + $0x18] sm:$0xff]  ;;  %v322_v0 = vld [vmem:[#allocation5 + $0x7a0] sm:$0xff] }
  0x2a   :  { %420 = vmatpush.msra.mxu2 %v160_v42  ;;  %440 = vmatpush.msra.mxu3 %v161_v43  ;;  %v323_v1 = vld [vmem:[#allocation5 + $0x7a8] sm:$0xff]  ;;  %v324_v2 = vld [vmem:[#allocation5 + $0x7b0] sm:$0xff]  ;;  %v325_v3 = vld [vmem:[#allocation5 + $0x7b8] sm:$0xff] }
  0x2b   :  { %381 = vmatpush.msra.mxu0 %v142_v44  ;;  %401 = vmatpush.msra.mxu1 %v143_v45  ;;  %v306_v4 = vld [vmem:[#allocation5 + $0x720] sm:$0xff]  ;;  %v307_v5 = vld [vmem:[#allocation5 + $0x728] sm:$0xff]  ;;  %v308_v6 = vld [vmem:[#allocation5 + $0x730] sm:$0xff] }
  0x2c   :  { %421 = vmatpush.msra.mxu2 %v144_v46  ;;  %441 = vmatpush.msra.mxu3 %v145_v47  ;;  %v309_v7 = vld [vmem:[#allocation5 + $0x738] sm:$0xff]  ;;  %v290_v8 = vld [vmem:[#allocation5 + $0x6a0] sm:$0xff]  ;;  %v291_v9 = vld [vmem:[#allocation5 + $0x6a8] sm:$0xff] }
  0x2d   :  { %382 = vmatpush.msra.mxu0 %v126_v48  ;;  %402 = vmatpush.msra.mxu1 %v127_v49  ;;  %v292_v10 = vld [vmem:[#allocation5 + $0x6b0] sm:$0xff]  ;;  %v293_v11 = vld [vmem:[#allocation5 + $0x6b8] sm:$0xff]  ;;  %v274_v12 = vld [vmem:[#allocation5 + $0x620] sm:$0xff] }
  0x2e   :  { %422 = vmatpush.msra.mxu2 %v128_v50  ;;  %442 = vmatpush.msra.mxu3 %v129_v51  ;;  %v275_v13 = vld [vmem:[#allocation5 + $0x628] sm:$0xff]  ;;  %v276_v14 = vld [vmem:[#allocation5 + $0x630] sm:$0xff]  ;;  %v277_v15 = vld [vmem:[#allocation5 + $0x638] sm:$0xff] }
  0x2f   :  { %383 = vmatpush.msra.mxu0 %v110_v52  ;;  %403 = vmatpush.msra.mxu1 %v111_v53  ;;  %v258_v16 = vld [vmem:[#allocation5 + $0x5a0] sm:$0xff]  ;;  %v259_v17 = vld [vmem:[#allocation5 + $0x5a8] sm:$0xff]  ;;  %v260_v18 = vld [vmem:[#allocation5 + $0x5b0] sm:$0xff] }
  0x30   :  { %423 = vmatpush.msra.mxu2 %v112_v54  ;;  %443 = vmatpush.msra.mxu3 %v113_v55  ;;  %v261_v19 = vld [vmem:[#allocation5 + $0x5b8] sm:$0xff]  ;;  %v242_v20 = vld [vmem:[#allocation5 + $0x520] sm:$0xff]  ;;  %v243_v21 = vld [vmem:[#allocation5 + $0x528] sm:$0xff] }
  0x31   :  { %384 = vmatpush.msra.mxu0 %v94_v56  ;;  %404 = vmatpush.msra.mxu1 %v95_v57  ;;  %v244_v22 = vld [vmem:[#allocation5 + $0x530] sm:$0xff]  ;;  %v245_v23 = vld [vmem:[#allocation5 + $0x538] sm:$0xff]  ;;  %v226_v24 = vld [vmem:[#allocation5 + $0x4a0] sm:$0xff] }
  0x32   :  { %424 = vmatpush.msra.mxu2 %v96_v58  ;;  %444 = vmatpush.msra.mxu3 %v97_v59  ;;  %v227_v25 = vld [vmem:[#allocation5 + $0x4a8] sm:$0xff]  ;;  %v228_v26 = vld [vmem:[#allocation5 + $0x4b0] sm:$0xff]  ;;  %v229_v27 = vld [vmem:[#allocation5 + $0x4b8] sm:$0xff] }
  0x33   :  { %385 = vmatpush.msra.mxu0 %v78_v60  ;;  %405 = vmatpush.msra.mxu1 %v79_v61  ;;  %v210_v28 = vld [vmem:[#allocation5 + $0x420] sm:$0xff]  ;;  %v211_v29 = vld [vmem:[#allocation5 + $0x428] sm:$0xff]  ;;  %v212_v30 = vld [vmem:[#allocation5 + $0x430] sm:$0xff] }
  0x34   :  { %425 = vmatpush.msra.mxu2 %v80_v62  ;;  %445 = vmatpush.msra.mxu3 %v81_v63  ;;  %v213_v31 = vld [vmem:[#allocation5 + $0x438] sm:$0xff]  ;;  %v194_v32 = vld [vmem:[#allocation5 + $0x3a0] sm:$0xff]  ;;  %v195_v33 = vld [vmem:[#allocation5 + $0x3a8] sm:$0xff] }
  0x35   :  { %450 = vmatpush.msrb.mxu0 %v322_v0  ;;  %470 = vmatpush.msrb.mxu1 %v323_v1  ;;  %v196_v34 = vld [vmem:[#allocation5 + $0x3b0] sm:$0xff]  ;;  %v197_v35 = vld [vmem:[#allocation5 + $0x3b8] sm:$0xff]  ;;  %v178_v36 = vld [vmem:[#allocation5 + $0x320] sm:$0xff] }
  0x36   :  { %490 = vmatpush.msrb.mxu2 %v324_v2  ;;  %510 = vmatpush.msrb.mxu3 %v325_v3  ;;  %v179_v37 = vld [vmem:[#allocation5 + $0x328] sm:$0xff]  ;;  %v180_v38 = vld [vmem:[#allocation5 + $0x330] sm:$0xff]  ;;  %v181_v39 = vld [vmem:[#allocation5 + $0x338] sm:$0xff] }
  0x37   :  { %451 = vmatpush.msrb.mxu0 %v306_v4  ;;  %471 = vmatpush.msrb.mxu1 %v307_v5  ;;  %v2068_v40 = vld [vmem:[#allocation2] sm:$0xff]  ;;  %v162_v41 = vld [vmem:[#allocation5 + $0x2a0] sm:$0xff]  ;;  %v163_v42 = vld [vmem:[#allocation5 + $0x2a8] sm:$0xff] }
  0x38   :  { %491 = vmatpush.msrb.mxu2 %v308_v6  ;;  %511 = vmatpush.msrb.mxu3 %v309_v7  ;;  %v164_v43 = vld [vmem:[#allocation5 + $0x2b0] sm:$0xff]  ;;  %v165_v44 = vld [vmem:[#allocation5 + $0x2b8] sm:$0xff]  ;;  %v146_v45 = vld [vmem:[#allocation5 + $0x220] sm:$0xff] }
  0x39   :  { %452 = vmatpush.msrb.mxu0 %v290_v8  ;;  %472 = vmatpush.msrb.mxu1 %v291_v9  ;;  %v147_v46 = vld [vmem:[#allocation5 + $0x228] sm:$0xff]  ;;  %v148_v47 = vld [vmem:[#allocation5 + $0x230] sm:$0xff]  ;;  %v149_v48 = vld [vmem:[#allocation5 + $0x238] sm:$0xff] }
  0x3a   :  { %492 = vmatpush.msrb.mxu2 %v292_v10  ;;  %512 = vmatpush.msrb.mxu3 %v293_v11  ;;  %v130_v49 = vld [vmem:[#allocation5 + $0x1a0] sm:$0xff]  ;;  %v131_v50 = vld [vmem:[#allocation5 + $0x1a8] sm:$0xff]  ;;  %v132_v51 = vld [vmem:[#allocation5 + $0x1b0] sm:$0xff] }
  0x3b   :  { %453 = vmatpush.msrb.mxu0 %v274_v12  ;;  %473 = vmatpush.msrb.mxu1 %v275_v13  ;;  %v133_v52 = vld [vmem:[#allocation5 + $0x1b8] sm:$0xff]  ;;  %v114_v53 = vld [vmem:[#allocation5 + $0x120] sm:$0xff]  ;;  %v115_v54 = vld [vmem:[#allocation5 + $0x128] sm:$0xff] }
  0x3c   :  { %493 = vmatpush.msrb.mxu2 %v276_v14  ;;  %513 = vmatpush.msrb.mxu3 %v277_v15  ;;  %v116_v55 = vld [vmem:[#allocation5 + $0x130] sm:$0xff]  ;;  %v117_v56 = vld [vmem:[#allocation5 + $0x138] sm:$0xff]  ;;  %v98_v57 = vld [vmem:[#allocation5 + $0xa0] sm:$0xff] }
  0x3d   :  { %454 = vmatpush.msrb.mxu0 %v258_v16  ;;  %474 = vmatpush.msrb.mxu1 %v259_v17  ;;  %v99_v58 = vld [vmem:[#allocation5 + $0xa8] sm:$0xff]  ;;  %v100_v59 = vld [vmem:[#allocation5 + $0xb0] sm:$0xff]  ;;  %v101_v60 = vld [vmem:[#allocation5 + $0xb8] sm:$0xff] }
  0x3e   :  { %494 = vmatpush.msrb.mxu2 %v260_v18  ;;  %514 = vmatpush.msrb.mxu3 %v261_v19  ;;  %v82_v61 = vld [vmem:[#allocation5 + $0x20] sm:$0xff]  ;;  %v83_v62 = vld [vmem:[#allocation5 + $0x28] sm:$0xff]  ;;  %v84_v63 = vld [vmem:[#allocation5 + $0x30] sm:$0xff] }
  0x3f   :  { %455 = vmatpush.msrb.mxu0 %v242_v20  ;;  %475 = vmatpush.msrb.mxu1 %v243_v21  ;;  %v85_v0 = vld [vmem:[#allocation5 + $0x38] sm:$0xff]  ;;  %v326_v1 = vld [vmem:[#allocation5 + $0x7c0] sm:$0xff]  ;;  %v327_v2 = vld [vmem:[#allocation5 + $0x7c8] sm:$0xff] }
  0x40   :  { %495 = vmatpush.msrb.mxu2 %v244_v22  ;;  %515 = vmatpush.msrb.mxu3 %v245_v23  ;;  %v328_v3 = vld [vmem:[#allocation5 + $0x7d0] sm:$0xff]  ;;  %v329_v4 = vld [vmem:[#allocation5 + $0x7d8] sm:$0xff]  ;;  %v310_v5 = vld [vmem:[#allocation5 + $0x740] sm:$0xff] }
  0x41   :  { %456 = vmatpush.msrb.mxu0 %v226_v24  ;;  %476 = vmatpush.msrb.mxu1 %v227_v25  ;;  %v311_v6 = vld [vmem:[#allocation5 + $0x748] sm:$0xff]  ;;  %v312_v7 = vld [vmem:[#allocation5 + $0x750] sm:$0xff]  ;;  %v313_v8 = vld [vmem:[#allocation5 + $0x758] sm:$0xff] }
  0x42   :  { %496 = vmatpush.msrb.mxu2 %v228_v26  ;;  %516 = vmatpush.msrb.mxu3 %v229_v27  ;;  %v295_v9 = vld [vmem:[#allocation5 + $0x6c8] sm:$0xff]  ;;  %v294_v10 = vld [vmem:[#allocation5 + $0x6c0] sm:$0xff]  ;;  %v296_v11 = vld [vmem:[#allocation5 + $0x6d0] sm:$0xff] }
  0x43   :  { %457 = vmatpush.msrb.mxu0 %v210_v28  ;;  %477 = vmatpush.msrb.mxu1 %v211_v29  ;;  %v297_v12 = vld [vmem:[#allocation5 + $0x6d8] sm:$0xff]  ;;  %v278_v13 = vld [vmem:[#allocation5 + $0x640] sm:$0xff]  ;;  %v279_v14 = vld [vmem:[#allocation5 + $0x648] sm:$0xff] }
  0x44   :  { %497 = vmatpush.msrb.mxu2 %v212_v30  ;;  %517 = vmatpush.msrb.mxu3 %v213_v31  ;;  %v280_v15 = vld [vmem:[#allocation5 + $0x650] sm:$0xff]  ;;  %v281_v16 = vld [vmem:[#allocation5 + $0x658] sm:$0xff]  ;;  %v262_v17 = vld [vmem:[#allocation5 + $0x5c0] sm:$0xff] }
  0x45   :  { %458 = vmatpush.msrb.mxu0 %v194_v32  ;;  %478 = vmatpush.msrb.mxu1 %v195_v33  ;;  %v263_v18 = vld [vmem:[#allocation5 + $0x5c8] sm:$0xff]  ;;  %v264_v19 = vld [vmem:[#allocation5 + $0x5d0] sm:$0xff]  ;;  %v265_v20 = vld [vmem:[#allocation5 + $0x5d8] sm:$0xff] }
  0x46   :  { %498 = vmatpush.msrb.mxu2 %v196_v34  ;;  %518 = vmatpush.msrb.mxu3 %v197_v35  ;;  %v246_v21 = vld [vmem:[#allocation5 + $0x540] sm:$0xff]  ;;  %v247_v22 = vld [vmem:[#allocation5 + $0x548] sm:$0xff]  ;;  %v248_v23 = vld [vmem:[#allocation5 + $0x550] sm:$0xff] }
  0x47   :  { %459 = vmatpush.msrb.mxu0 %v178_v36  ;;  %479 = vmatpush.msrb.mxu1 %v179_v37  ;;  %v249_v24 = vld [vmem:[#allocation5 + $0x558] sm:$0xff]  ;;  %v230_v25 = vld [vmem:[#allocation5 + $0x4c0] sm:$0xff]  ;;  %v231_v26 = vld [vmem:[#allocation5 + $0x4c8] sm:$0xff] }
  0x48   :  { %499 = vmatpush.msrb.mxu2 %v180_v38  ;;  %519 = vmatpush.msrb.mxu3 %v181_v39  ;;  %v232_v27 = vld [vmem:[#allocation5 + $0x4d0] sm:$0xff]  ;;  %v233_v28 = vld [vmem:[#allocation5 + $0x4d8] sm:$0xff]  ;;  %v214_v29 = vld [vmem:[#allocation5 + $0x440] sm:$0xff] }
  0x49   :  { %426 = vmatmul.f32.vlgmr.msra.gmra.mxu2 %v2068_v40  ;;  %446 = vmatmul.f32.vlgmr.msra.gmra.mxu3 %v2068_v40  ;;  %v215_v30 = vld [vmem:[#allocation5 + $0x448] sm:$0xff]  ;;  %v216_v31 = vld [vmem:[#allocation5 + $0x450] sm:$0xff]  ;;  %v217_v32 = vld [vmem:[#allocation5 + $0x458] sm:$0xff] }
  0x4a   :  { %460 = vmatpush.msrb.mxu0 %v162_v41  ;;  %480 = vmatpush.msrb.mxu1 %v163_v42  ;;  %v198_v33 = vld [vmem:[#allocation5 + $0x3c0] sm:$0xff]  ;;  %v199_v34 = vld [vmem:[#allocation5 + $0x3c8] sm:$0xff]  ;;  %v200_v35 = vld [vmem:[#allocation5 + $0x3d0] sm:$0xff] }
  0x4b   :  { %500 = vmatpush.msrb.mxu2 %v164_v43  ;;  %520 = vmatpush.msrb.mxu3 %v165_v44  ;;  %v201_v36 = vld [vmem:[#allocation5 + $0x3d8] sm:$0xff]  ;;  %v182_v37 = vld [vmem:[#allocation5 + $0x340] sm:$0xff]  ;;  %v183_v38 = vld [vmem:[#allocation5 + $0x348] sm:$0xff] }
  0x4c   :  { %461 = vmatpush.msrb.mxu0 %v146_v45  ;;  %481 = vmatpush.msrb.mxu1 %v147_v46  ;;  %v184_v39 = vld [vmem:[#allocation5 + $0x350] sm:$0xff]  ;;  %v185_v41 = vld [vmem:[#allocation5 + $0x358] sm:$0xff]  ;;  %v166_v42 = vld [vmem:[#allocation5 + $0x2c0] sm:$0xff] }
  0x4d   :  { %501 = vmatpush.msrb.mxu2 %v148_v47  ;;  %521 = vmatpush.msrb.mxu3 %v149_v48  ;;  %v167_v43 = vld [vmem:[#allocation5 + $0x2c8] sm:$0xff]  ;;  %v168_v44 = vld [vmem:[#allocation5 + $0x2d0] sm:$0xff]  ;;  %v169_v45 = vld [vmem:[#allocation5 + $0x2d8] sm:$0xff] }
  0x4e   :  { %462 = vmatpush.msrb.mxu0 %v130_v49  ;;  %482 = vmatpush.msrb.mxu1 %v131_v50  ;;  %v150_v46 = vld [vmem:[#allocation5 + $0x240] sm:$0xff]  ;;  %v151_v47 = vld [vmem:[#allocation5 + $0x248] sm:$0xff]  ;;  %v152_v48 = vld [vmem:[#allocation5 + $0x250] sm:$0xff] }
  0x4f   :  { %502 = vmatpush.msrb.mxu2 %v132_v51  ;;  %522 = vmatpush.msrb.mxu3 %v133_v52  ;;  %v153_v49 = vld [vmem:[#allocation5 + $0x258] sm:$0xff]  ;;  %v134_v50 = vld [vmem:[#allocation5 + $0x1c0] sm:$0xff]  ;;  %v135_v51 = vld [vmem:[#allocation5 + $0x1c8] sm:$0xff] }
  0x50   :  { %386 = vmatmul.f32.vlgmr.msra.gmra.mxu0 %v2068_v40  ;;  %406 = vmatmul.f32.vlgmr.msra.gmra.mxu1 %v2068_v40  ;;  %v136_v52 = vld [vmem:[#allocation5 + $0x1d0] sm:$0xff] }
  0x51   :  { %463 = vmatpush.msrb.mxu0 %v114_v53  ;;  %483 = vmatpush.msrb.mxu1 %v115_v54  ;;  %v137_v53 = vld [vmem:[#allocation5 + $0x1d8] sm:$0xff]  ;;  %v118_v54 = vld [vmem:[#allocation5 + $0x140] sm:$0xff] }
  0x52   :  { %503 = vmatpush.msrb.mxu2 %v116_v55  ;;  %523 = vmatpush.msrb.mxu3 %v117_v56  ;;  %v119_v55 = vld [vmem:[#allocation5 + $0x148] sm:$0xff]  ;;  %v120_v56 = vld [vmem:[#allocation5 + $0x150] sm:$0xff] }
  0x53   :  { %464 = vmatpush.msrb.mxu0 %v98_v57  ;;  %484 = vmatpush.msrb.mxu1 %v99_v58  ;;  %v121_v57 = vld [vmem:[#allocation5 + $0x158] sm:$0xff]  ;;  %v102_v58 = vld [vmem:[#allocation5 + $0xc0] sm:$0xff] }
  0x54   :  { %504 = vmatpush.msrb.mxu2 %v100_v59  ;;  %524 = vmatpush.msrb.mxu3 %v101_v60  ;;  %v103_v59 = vld [vmem:[#allocation5 + $0xc8] sm:$0xff]  ;;  %v104_v60 = vld [vmem:[#allocation5 + $0xd0] sm:$0xff] }
  0x55   :  { %465 = vmatpush.msrb.mxu0 %v82_v61  ;;  %485 = vmatpush.msrb.mxu1 %v83_v62  ;;  %v105_v61 = vld [vmem:[#allocation5 + $0xd8] sm:$0xff]  ;;  %v86_v62 = vld [vmem:[#allocation5 + $0x40] sm:$0xff] }
  0x56   :  { %505 = vmatpush.msrb.mxu2 %v84_v63  ;;  %525 = vmatpush.msrb.mxu3 %v85_v0  ;;  %v87_v63 = vld [vmem:[#allocation5 + $0x48] sm:$0xff]  ;;  %v88_v0 = vld [vmem:[#allocation5 + $0x50] sm:$0xff] }
  0x57   :  { %506 = vmatmul.f32.vlgmr.msrb.gmra.mxu2 %v2068_v40  ;;  %530 = vmatpush.msra.mxu0 %v326_v1  ;;  %v89_v1 = vld [vmem:[#allocation5 + $0x58] sm:$0xff] }
  0x58   :  { %550 = vmatpush.msra.mxu1 %v327_v2  ;;  %570 = vmatpush.msra.mxu2 %v328_v3  ;;  %v330_v2 = vld [vmem:[#allocation5 + $0x7e0] sm:$0xff]  ;;  %v331_v3 = vld [vmem:[#allocation5 + $0x7e8] sm:$0xff] }
  0x59   :  { %590 = vmatpush.msra.mxu3 %v329_v4  ;;  %531 = vmatpush.msra.mxu0 %v310_v5  ;;  %v332_v4 = vld [vmem:[#allocation5 + $0x7f0] sm:$0xff]  ;;  %v333_v5 = vld [vmem:[#allocation5 + $0x7f8] sm:$0xff] }
  0x5a   :  { %526 = vmatmul.f32.vlgmr.msrb.gmra.mxu3 %v2068_v40  ;;  %551 = vmatpush.msra.mxu1 %v311_v6  ;;  %v314_v6 = vld [vmem:[#allocation5 + $0x760] sm:$0xff] }
  0x5b   :  { %571 = vmatpush.msra.mxu2 %v312_v7  ;;  %591 = vmatpush.msra.mxu3 %v313_v8  ;;  %v315_v7 = vld [vmem:[#allocation5 + $0x768] sm:$0xff]  ;;  %v316_v8 = vld [vmem:[#allocation5 + $0x770] sm:$0xff] }
  0x5c   :  { %466 = vmatmul.f32.vlgmr.msrb.gmra.mxu0 %v2068_v40  ;;  %552 = vmatpush.msra.mxu1 %v295_v9  ;;  %v317_v9 = vld [vmem:[#allocation5 + $0x778] sm:$0xff] }
  0x5d   :  { %532 = vmatpush.msra.mxu0 %v294_v10  ;;  %572 = vmatpush.msra.mxu2 %v296_v11  ;;  %v298_v10 = vld [vmem:[#allocation5 + $0x6e0] sm:$0xff]  ;;  %v299_v11 = vld [vmem:[#allocation5 + $0x6e8] sm:$0xff] }
  0x5e   :  { %592 = vmatpush.msra.mxu3 %v297_v12  ;;  %486 = vmatmul.f32.vlgmr.msrb.gmra.mxu1 %v2068_v40  ;;  %v300_v12 = vld [vmem:[#allocation5 + $0x6f0] sm:$0xff] }
  0x5f   :  { %533 = vmatpush.msra.mxu0 %v278_v13  ;;  %553 = vmatpush.msra.mxu1 %v279_v14  ;;  %v301_v13 = vld [vmem:[#allocation5 + $0x6f8] sm:$0xff]  ;;  %v282_v14 = vld [vmem:[#allocation5 + $0x660] sm:$0xff] }
  0x60   :  { %573 = vmatpush.msra.mxu2 %v280_v15  ;;  %593 = vmatpush.msra.mxu3 %v281_v16  ;;  %v283_v15 = vld [vmem:[#allocation5 + $0x668] sm:$0xff]  ;;  %v284_v16 = vld [vmem:[#allocation5 + $0x670] sm:$0xff] }
  0x61   :  { %534 = vmatpush.msra.mxu0 %v262_v17  ;;  %554 = vmatpush.msra.mxu1 %v263_v18  ;;  %v285_v17 = vld [vmem:[#allocation5 + $0x678] sm:$0xff]  ;;  %v266_v18 = vld [vmem:[#allocation5 + $0x5e0] sm:$0xff] }
  0x62   :  { %574 = vmatpush.msra.mxu2 %v264_v19  ;;  %594 = vmatpush.msra.mxu3 %v265_v20  ;;  %v267_v19 = vld [vmem:[#allocation5 + $0x5e8] sm:$0xff]  ;;  %v268_v20 = vld [vmem:[#allocation5 + $0x5f0] sm:$0xff] }
  0x63   :  { %535 = vmatpush.msra.mxu0 %v246_v21  ;;  %555 = vmatpush.msra.mxu1 %v247_v22  ;;  %v269_v21 = vld [vmem:[#allocation5 + $0x5f8] sm:$0xff]  ;;  %v250_v22 = vld [vmem:[#allocation5 + $0x560] sm:$0xff] }
  0x64   :  { %575 = vmatpush.msra.mxu2 %v248_v23  ;;  %595 = vmatpush.msra.mxu3 %v249_v24  ;;  %v251_v23 = vld [vmem:[#allocation5 + $0x568] sm:$0xff]  ;;  %v252_v24 = vld [vmem:[#allocation5 + $0x570] sm:$0xff] }
  0x65   :  { %536 = vmatpush.msra.mxu0 %v230_v25  ;;  %556 = vmatpush.msra.mxu1 %v231_v26  ;;  %v253_v25 = vld [vmem:[#allocation5 + $0x578] sm:$0xff]  ;;  %v234_v26 = vld [vmem:[#allocation5 + $0x4e0] sm:$0xff] }
  0x66   :  { %576 = vmatpush.msra.mxu2 %v232_v27  ;;  %596 = vmatpush.msra.mxu3 %v233_v28  ;;  %v235_v27 = vld [vmem:[#allocation5 + $0x4e8] sm:$0xff]  ;;  %v236_v28 = vld [vmem:[#allocation5 + $0x4f0] sm:$0xff] }
  0x67   :  { %537 = vmatpush.msra.mxu0 %v214_v29  ;;  %557 = vmatpush.msra.mxu1 %v215_v30  ;;  %v237_v29 = vld [vmem:[#allocation5 + $0x4f8] sm:$0xff]  ;;  %v218_v30 = vld [vmem:[#allocation5 + $0x460] sm:$0xff] }
  0x68   :  { %577 = vmatpush.msra.mxu2 %v216_v31  ;;  %597 = vmatpush.msra.mxu3 %v217_v32  ;;  %v219_v31 = vld [vmem:[#allocation5 + $0x468] sm:$0xff]  ;;  %v220_v32 = vld [vmem:[#allocation5 + $0x470] sm:$0xff] }
  0x69   :  { %538 = vmatpush.msra.mxu0 %v198_v33  ;;  %558 = vmatpush.msra.mxu1 %v199_v34  ;;  %v221_v33 = vld [vmem:[#allocation5 + $0x478] sm:$0xff]  ;;  %v202_v34 = vld [vmem:[#allocation5 + $0x3e0] sm:$0xff] }
  0x6a   :  { %578 = vmatpush.msra.mxu2 %v200_v35  ;;  %598 = vmatpush.msra.mxu3 %v201_v36  ;;  %v203_v35 = vld [vmem:[#allocation5 + $0x3e8] sm:$0xff]  ;;  %v204_v36 = vld [vmem:[#allocation5 + $0x3f0] sm:$0xff] }
  0x6b   :  { %539 = vmatpush.msra.mxu0 %v182_v37  ;;  %559 = vmatpush.msra.mxu1 %v183_v38  ;;  %v205_v37 = vld [vmem:[#allocation5 + $0x3f8] sm:$0xff]  ;;  %v186_v38 = vld [vmem:[#allocation5 + $0x360] sm:$0xff] }
  0x6c   :  { %579 = vmatpush.msra.mxu2 %v184_v39  ;;  %599 = vmatpush.msra.mxu3 %v185_v41  ;;  %v187_v39 = vld [vmem:[#allocation5 + $0x368] sm:$0xff]  ;;  %v188_v41 = vld [vmem:[#allocation5 + $0x370] sm:$0xff] }
  0x6d   :  { %540 = vmatpush.msra.mxu0 %v166_v42  ;;  %560 = vmatpush.msra.mxu1 %v167_v43  ;;  %v189_v42 = vld [vmem:[#allocation5 + $0x378] sm:$0xff]  ;;  %v170_v43 = vld [vmem:[#allocation5 + $0x2e0] sm:$0xff] }
  0x6e   :  { %580 = vmatpush.msra.mxu2 %v168_v44  ;;  %600 = vmatpush.msra.mxu3 %v169_v45  ;;  %v171_v44 = vld [vmem:[#allocation5 + $0x2e8] sm:$0xff]  ;;  %v172_v45 = vld [vmem:[#allocation5 + $0x2f0] sm:$0xff] }
  0x6f   :  { %541 = vmatpush.msra.mxu0 %v150_v46  ;;  %561 = vmatpush.msra.mxu1 %v151_v47  ;;  %v173_v46 = vld [vmem:[#allocation5 + $0x2f8] sm:$0xff]  ;;  %v154_v47 = vld [vmem:[#allocation5 + $0x260] sm:$0xff] }
  0x70   :  { %581 = vmatpush.msra.mxu2 %v152_v48  ;;  %601 = vmatpush.msra.mxu3 %v153_v49  ;;  %v155_v48 = vld [vmem:[#allocation5 + $0x268] sm:$0xff]  ;;  %v156_v49 = vld [vmem:[#allocation5 + $0x270] sm:$0xff] }
  0x71   :  { %542 = vmatpush.msra.mxu0 %v134_v50  ;;  %562 = vmatpush.msra.mxu1 %v135_v51  ;;  %v157_v50 = vld [vmem:[#allocation5 + $0x278] sm:$0xff]  ;;  %v138_v51 = vld [vmem:[#allocation5 + $0x1e0] sm:$0xff] }
  0x72   :  { %582 = vmatpush.msra.mxu2 %v136_v52  ;;  %602 = vmatpush.msra.mxu3 %v137_v53  ;;  %v139_v52 = vld [vmem:[#allocation5 + $0x1e8] sm:$0xff]  ;;  %v140_v53 = vld [vmem:[#allocation5 + $0x1f0] sm:$0xff] }
  0x73   :  { %543 = vmatpush.msra.mxu0 %v118_v54  ;;  %563 = vmatpush.msra.mxu1 %v119_v55  ;;  %v141_v54 = vld [vmem:[#allocation5 + $0x1f8] sm:$0xff]  ;;  %v122_v55 = vld [vmem:[#allocation5 + $0x160] sm:$0xff] }
  0x74   :  { %583 = vmatpush.msra.mxu2 %v120_v56  ;;  %603 = vmatpush.msra.mxu3 %v121_v57  ;;  %v123_v56 = vld [vmem:[#allocation5 + $0x168] sm:$0xff]  ;;  %v124_v57 = vld [vmem:[#allocation5 + $0x170] sm:$0xff] }
  0x75   :  { %544 = vmatpush.msra.mxu0 %v102_v58  ;;  %564 = vmatpush.msra.mxu1 %v103_v59  ;;  %v125_v58 = vld [vmem:[#allocation5 + $0x178] sm:$0xff]  ;;  %v106_v59 = vld [vmem:[#allocation5 + $0xe0] sm:$0xff] }
  0x76   :  { %584 = vmatpush.msra.mxu2 %v104_v60  ;;  %604 = vmatpush.msra.mxu3 %v105_v61  ;;  %v107_v60 = vld [vmem:[#allocation5 + $0xe8] sm:$0xff]  ;;  %v108_v61 = vld [vmem:[#allocation5 + $0xf0] sm:$0xff] }
  0x77   :  { %545 = vmatpush.msra.mxu0 %v86_v62  ;;  %565 = vmatpush.msra.mxu1 %v87_v63  ;;  %v109_v62 = vld [vmem:[#allocation5 + $0xf8] sm:$0xff]  ;;  %v90_v63 = vld [vmem:[#allocation5 + $0x60] sm:$0xff] }
  0x78   :  { %585 = vmatpush.msra.mxu2 %v88_v0  ;;  %605 = vmatpush.msra.mxu3 %v89_v1  ;;  %v91_v0 = vld [vmem:[#allocation5 + $0x68] sm:$0xff]  ;;  %v92_v1 = vld [vmem:[#allocation5 + $0x70] sm:$0xff] }
  0x79   :  { %546 = vmatmul.f32.vlgmr.msra.gmra.mxu0 %v2068_v40  ;;  %586 = vmatmul.f32.vlgmr.msra.gmra.mxu2 %v2068_v40 }
  0x7a   :  { %610 = vmatpush.msrb.mxu0 %v330_v2  ;;  %630 = vmatpush.msrb.mxu1 %v331_v3  ;;  %v93_v2 = vld [vmem:[#allocation5 + $0x78] sm:$0xff]  ;;  %v736_v3 = vld [vmem:[#allocation7 + $0xf0] sm:$0xff] }
  0x7b   :  { %650 = vmatpush.msrb.mxu2 %v332_v4  ;;  %670 = vmatpush.msrb.mxu3 %v333_v5  ;;  %v768_v4 = vld [vmem:[#allocation7 + $0x1f0] sm:$0xff] }
  0x7c   :  { %566 = vmatmul.f32.vlgmr.msra.gmra.mxu1 %v2068_v40  ;;  %606 = vmatmul.f32.vlgmr.msra.gmra.mxu3 %v2068_v40  ;;  %v800_v5 = vld [vmem:[#allocation7 + $0x2f0] sm:$0xff] }
  0x7d   :  { %611 = vmatpush.msrb.mxu0 %v314_v6  ;;  %631 = vmatpush.msrb.mxu1 %v315_v7  ;;  %v832_v6 = vld [vmem:[#allocation7 + $0x3f0] sm:$0xff]  ;;  %v734_v7 = vld [vmem:[#allocation7 + $0xe0] sm:$0xff] }
  0x7e   :  { %651 = vmatpush.msrb.mxu2 %v316_v8  ;;  %671 = vmatpush.msrb.mxu3 %v317_v9  ;;  %v766_v8 = vld [vmem:[#allocation7 + $0x1e0] sm:$0xff] }
  0x7f   :  { %612 = vmatpush.msrb.mxu0 %v298_v10  ;;  %632 = vmatpush.msrb.mxu1 %v299_v11  ;;  %v798_v9 = vld [vmem:[#allocation7 + $0x2e0] sm:$0xff]  ;;  %v732_v11 = vld [vmem:[#allocation7 + $0xd0] sm:$0xff] }
  0x80   :  { %652 = vmatpush.msrb.mxu2 %v300_v12  ;;  %672 = vmatpush.msrb.mxu3 %v301_v13  ;;  %v830_v10 = vld [vmem:[#allocation7 + $0x3e0] sm:$0xff]  ;;  %v764_v12 = vld [vmem:[#allocation7 + $0x1d0] sm:$0xff] }
  0x81   :  { %613 = vmatpush.msrb.mxu0 %v282_v14  ;;  %633 = vmatpush.msrb.mxu1 %v283_v15  ;;  %v796_v13 = vld [vmem:[#allocation7 + $0x2d0] sm:$0xff]  ;;  %v730_v15 = vld [vmem:[#allocation7 + $0xc0] sm:$0xff] }
  0x82   :  { %653 = vmatpush.msrb.mxu2 %v284_v16  ;;  %673 = vmatpush.msrb.mxu3 %v285_v17  ;;  %v828_v14 = vld [vmem:[#allocation7 + $0x3d0] sm:$0xff]  ;;  %v762_v16 = vld [vmem:[#allocation7 + $0x1c0] sm:$0xff] }
  0x83   :  { %614 = vmatpush.msrb.mxu0 %v266_v18  ;;  %634 = vmatpush.msrb.mxu1 %v267_v19  ;;  %v794_v17 = vld [vmem:[#allocation7 + $0x2c0] sm:$0xff]  ;;  %v728_v19 = vld [vmem:[#allocation7 + $0xb0] sm:$0xff] }
  0x84   :  { %654 = vmatpush.msrb.mxu2 %v268_v20  ;;  %674 = vmatpush.msrb.mxu3 %v269_v21  ;;  %v826_v18 = vld [vmem:[#allocation7 + $0x3c0] sm:$0xff]  ;;  %v760_v20 = vld [vmem:[#allocation7 + $0x1b0] sm:$0xff] }
  0x85   :  { %615 = vmatpush.msrb.mxu0 %v250_v22  ;;  %635 = vmatpush.msrb.mxu1 %v251_v23  ;;  %v824_v21 = vld [vmem:[#allocation7 + $0x3b0] sm:$0xff]  ;;  %v726_v22 = vld [vmem:[#allocation7 + $0xa0] sm:$0xff] }
  0x86   :  { %655 = vmatpush.msrb.mxu2 %v252_v24  ;;  %675 = vmatpush.msrb.mxu3 %v253_v25  ;;  %v758_v23 = vld [vmem:[#allocation7 + $0x1a0] sm:$0xff] }
  0x87   :  { %616 = vmatpush.msrb.mxu0 %v234_v26  ;;  %636 = vmatpush.msrb.mxu1 %v235_v27  ;;  %v790_v24 = vld [vmem:[#allocation7 + $0x2a0] sm:$0xff]  ;;  %v724_v26 = vld [vmem:[#allocation7 + $0x90] sm:$0xff] }
  0x88   :  { %656 = vmatpush.msrb.mxu2 %v236_v28  ;;  %676 = vmatpush.msrb.mxu3 %v237_v29  ;;  %v822_v25 = vld [vmem:[#allocation7 + $0x3a0] sm:$0xff]  ;;  %v756_v27 = vld [vmem:[#allocation7 + $0x190] sm:$0xff] }
  0x89   :  { %617 = vmatpush.msrb.mxu0 %v218_v30  ;;  %637 = vmatpush.msrb.mxu1 %v219_v31  ;;  %v788_v28 = vld [vmem:[#allocation7 + $0x290] sm:$0xff]  ;;  %v722_v30 = vld [vmem:[#allocation7 + $0x80] sm:$0xff] }
  0x8a   :  { %657 = vmatpush.msrb.mxu2 %v220_v32  ;;  %677 = vmatpush.msrb.mxu3 %v221_v33  ;;  %v820_v29 = vld [vmem:[#allocation7 + $0x390] sm:$0xff]  ;;  %v754_v31 = vld [vmem:[#allocation7 + $0x180] sm:$0xff] }
  0x8b   :  { %618 = vmatpush.msrb.mxu0 %v202_v34  ;;  %638 = vmatpush.msrb.mxu1 %v203_v35  ;;  %v786_v32 = vld [vmem:[#allocation7 + $0x280] sm:$0xff]  ;;  %v720_v34 = vld [vmem:[#allocation7 + $0x70] sm:$0xff] }
  0x8c   :  { %658 = vmatpush.msrb.mxu2 %v204_v36  ;;  %678 = vmatpush.msrb.mxu3 %v205_v37  ;;  %v818_v33 = vld [vmem:[#allocation7 + $0x380] sm:$0xff]  ;;  %v752_v35 = vld [vmem:[#allocation7 + $0x170] sm:$0xff] }
  0x8d   :  { %619 = vmatpush.msrb.mxu0 %v186_v38  ;;  %639 = vmatpush.msrb.mxu1 %v187_v39  ;;  %v784_v36 = vld [vmem:[#allocation7 + $0x270] sm:$0xff]  ;;  %v718_v38 = vld [vmem:[#allocation7 + $0x60] sm:$0xff] }
  0x8e   :  { %659 = vmatpush.msrb.mxu2 %v188_v41  ;;  %679 = vmatpush.msrb.mxu3 %v189_v42  ;;  %v816_v37 = vld [vmem:[#allocation7 + $0x370] sm:$0xff]  ;;  %v750_v39 = vld [vmem:[#allocation7 + $0x160] sm:$0xff] }
  0x8f   :  { %620 = vmatpush.msrb.mxu0 %v170_v43  ;;  %640 = vmatpush.msrb.mxu1 %v171_v44  ;;  %v782_v41 = vld [vmem:[#allocation7 + $0x260] sm:$0xff]  ;;  %v716_v43 = vld [vmem:[#allocation7 + $0x50] sm:$0xff] }
  0x90   :  { %660 = vmatpush.msrb.mxu2 %v172_v45  ;;  %680 = vmatpush.msrb.mxu3 %v173_v46  ;;  %v814_v42 = vld [vmem:[#allocation7 + $0x360] sm:$0xff]  ;;  %v748_v44 = vld [vmem:[#allocation7 + $0x150] sm:$0xff] }
  0x91   :  { %621 = vmatpush.msrb.mxu0 %v154_v47  ;;  %641 = vmatpush.msrb.mxu1 %v155_v48  ;;  %v780_v45 = vld [vmem:[#allocation7 + $0x250] sm:$0xff]  ;;  %v714_v47 = vld [vmem:[#allocation7 + $0x40] sm:$0xff] }
  0x92   :  { %661 = vmatpush.msrb.mxu2 %v156_v49  ;;  %681 = vmatpush.msrb.mxu3 %v157_v50  ;;  %v812_v46 = vld [vmem:[#allocation7 + $0x350] sm:$0xff]  ;;  %v746_v48 = vld [vmem:[#allocation7 + $0x140] sm:$0xff] }
  0x93   :  { %622 = vmatpush.msrb.mxu0 %v138_v51  ;;  %642 = vmatpush.msrb.mxu1 %v139_v52  ;;  %v778_v49 = vld [vmem:[#allocation7 + $0x240] sm:$0xff]  ;;  %v712_v51 = vld [vmem:[#allocation7 + $0x30] sm:$0xff] }
  0x94   :  { %662 = vmatpush.msrb.mxu2 %v140_v53  ;;  %682 = vmatpush.msrb.mxu3 %v141_v54  ;;  %v810_v50 = vld [vmem:[#allocation7 + $0x340] sm:$0xff]  ;;  %v744_v52 = vld [vmem:[#allocation7 + $0x130] sm:$0xff] }
  0x95   :  { %623 = vmatpush.msrb.mxu0 %v122_v55  ;;  %643 = vmatpush.msrb.mxu1 %v123_v56  ;;  %v776_v53 = vld [vmem:[#allocation7 + $0x230] sm:$0xff]  ;;  %v710_v55 = vld [vmem:[#allocation7 + $0x20] sm:$0xff] }
  0x96   :  { %663 = vmatpush.msrb.mxu2 %v124_v57  ;;  %683 = vmatpush.msrb.mxu3 %v125_v58  ;;  %v808_v54 = vld [vmem:[#allocation7 + $0x330] sm:$0xff]  ;;  %v742_v56 = vld [vmem:[#allocation7 + $0x120] sm:$0xff] }
  0x97   :  { %624 = vmatpush.msrb.mxu0 %v106_v59  ;;  %644 = vmatpush.msrb.mxu1 %v107_v60  ;;  %v774_v57 = vld [vmem:[#allocation7 + $0x220] sm:$0xff]  ;;  %v708_v59 = vld [vmem:[#allocation7 + $0x10] sm:$0xff] }
  0x98   :  { %664 = vmatpush.msrb.mxu2 %v108_v61  ;;  %684 = vmatpush.msrb.mxu3 %v109_v62  ;;  %v806_v58 = vld [vmem:[#allocation7 + $0x320] sm:$0xff]  ;;  %v740_v60 = vld [vmem:[#allocation7 + $0x110] sm:$0xff] }
  0x99   :  { %625 = vmatpush.msrb.mxu0 %v90_v63  ;;  %645 = vmatpush.msrb.mxu1 %v91_v0  ;;  %v772_v61 = vld [vmem:[#allocation7 + $0x210] sm:$0xff]  ;;  %v706_v63 = vld [vmem:[#allocation7] sm:$0xff] }
  0x9a   :  { %665 = vmatpush.msrb.mxu2 %v92_v1  ;;  %685 = vmatpush.msrb.mxu3 %v93_v2  ;;  %v804_v62 = vld [vmem:[#allocation7 + $0x310] sm:$0xff]  ;;  %v738_v0 = vld [vmem:[#allocation7 + $0x100] sm:$0xff] }
  0x9b   :  { %626 = vmatmul.f32.vlgmr.msrb.gmra.mxu0 %v2068_v40  ;;  %666 = vmatmul.f32.vlgmr.msrb.gmra.mxu2 %v2068_v40  ;;  %v770_v1 = vld [vmem:[#allocation7 + $0x200] sm:$0xff] }
  0x9c   :  { %1224 = vmatpush.msra.mxu0 %v736_v3  ;;  %1244 = vmatpush.msra.mxu1 %v768_v4  ;;  %v802_v2 = vld [vmem:[#allocation7 + $0x300] sm:$0xff]  ;;  %v864_v3 = vld [vmem:[#allocation7 + $0x4f0] sm:$0xff] }
  0x9d   :  { %1264 = vmatpush.msra.mxu2 %v800_v5  ;;  %1284 = vmatpush.msra.mxu3 %v832_v6  ;;  %v896_v4 = vld [vmem:[#allocation7 + $0x5f0] sm:$0xff] }
  0x9e   :  { %646 = vmatmul.f32.vlgmr.msrb.gmra.mxu1 %v2068_v40  ;;  %686 = vmatmul.f32.vlgmr.msrb.gmra.mxu3 %v2068_v40  ;;  %v792_v40 = vld [vmem:[#allocation7 + $0x2b0] sm:$0xff] }
  0x9f   :  { %1225 = vmatpush.msra.mxu0 %v734_v7  ;;  %1245 = vmatpush.msra.mxu1 %v766_v8  ;;  %v928_v5 = vld [vmem:[#allocation7 + $0x6f0] sm:$0xff]  ;;  %v862_v7 = vld [vmem:[#allocation7 + $0x4e0] sm:$0xff] }
  0xa0   :  { %1265 = vmatpush.msra.mxu2 %v798_v9  ;;  %1285 = vmatpush.msra.mxu3 %v830_v10  ;;  %v960_v6 = vld [vmem:[#allocation7 + $0x7f0] sm:$0xff]  ;;  %v894_v8 = vld [vmem:[#allocation7 + $0x5e0] sm:$0xff] }
  0xa1   :  { %1226 = vmatpush.msra.mxu0 %v732_v11  ;;  %1246 = vmatpush.msra.mxu1 %v764_v12  ;;  %v926_v9 = vld [vmem:[#allocation7 + $0x6e0] sm:$0xff]  ;;  %v860_v11 = vld [vmem:[#allocation7 + $0x4d0] sm:$0xff] }
  0xa2   :  { %1266 = vmatpush.msra.mxu2 %v796_v13  ;;  %1286 = vmatpush.msra.mxu3 %v828_v14  ;;  %v958_v10 = vld [vmem:[#allocation7 + $0x7e0] sm:$0xff]  ;;  %v892_v12 = vld [vmem:[#allocation7 + $0x5d0] sm:$0xff] }
  0xa3   :  { %1227 = vmatpush.msra.mxu0 %v730_v15  ;;  %1247 = vmatpush.msra.mxu1 %v762_v16  ;;  %v924_v13 = vld [vmem:[#allocation7 + $0x6d0] sm:$0xff]  ;;  %v858_v15 = vld [vmem:[#allocation7 + $0x4c0] sm:$0xff] }
  0xa4   :  { %1267 = vmatpush.msra.mxu2 %v794_v17  ;;  %1287 = vmatpush.msra.mxu3 %v826_v18  ;;  %v956_v14 = vld [vmem:[#allocation7 + $0x7d0] sm:$0xff]  ;;  %v890_v16 = vld [vmem:[#allocation7 + $0x5c0] sm:$0xff] }
  0xa5   :  { %1228 = vmatpush.msra.mxu0 %v728_v19  ;;  %1248 = vmatpush.msra.mxu1 %v760_v20  ;;  %v922_v17 = vld [vmem:[#allocation7 + $0x6c0] sm:$0xff]  ;;  %v856_v19 = vld [vmem:[#allocation7 + $0x4b0] sm:$0xff] }
  0xa6   :  { %1268 = vmatpush.msra.mxu2 %v792_v40  ;;  %1288 = vmatpush.msra.mxu3 %v824_v21  ;;  %v954_v18 = vld [vmem:[#allocation7 + $0x7c0] sm:$0xff]  ;;  %v888_v20 = vld [vmem:[#allocation7 + $0x5b0] sm:$0xff] }
  0xa7   :  { %1229 = vmatpush.msra.mxu0 %v726_v22  ;;  %1249 = vmatpush.msra.mxu1 %v758_v23  ;;  %v920_v40 = vld [vmem:[#allocation7 + $0x6b0] sm:$0xff]  ;;  %v854_v22 = vld [vmem:[#allocation7 + $0x4a0] sm:$0xff] }
  0xa8   :  { %1269 = vmatpush.msra.mxu2 %v790_v24  ;;  %1289 = vmatpush.msra.mxu3 %v822_v25  ;;  %v952_v21 = vld [vmem:[#allocation7 + $0x7b0] sm:$0xff]  ;;  %v886_v23 = vld [vmem:[#allocation7 + $0x5a0] sm:$0xff] }
  0xa9   :  { %1230 = vmatpush.msra.mxu0 %v724_v26  ;;  %1250 = vmatpush.msra.mxu1 %v756_v27  ;;  %v918_v24 = vld [vmem:[#allocation7 + $0x6a0] sm:$0xff]  ;;  %v852_v26 = vld [vmem:[#allocation7 + $0x490] sm:$0xff] }
  0xaa   :  { %1270 = vmatpush.msra.mxu2 %v788_v28  ;;  %1290 = vmatpush.msra.mxu3 %v820_v29  ;;  %v950_v25 = vld [vmem:[#allocation7 + $0x7a0] sm:$0xff]  ;;  %v884_v27 = vld [vmem:[#allocation7 + $0x590] sm:$0xff] }
  0xab   :  { %1231 = vmatpush.msra.mxu0 %v722_v30  ;;  %1251 = vmatpush.msra.mxu1 %v754_v31  ;;  %v916_v28 = vld [vmem:[#allocation7 + $0x690] sm:$0xff]  ;;  %v850_v30 = vld [vmem:[#allocation7 + $0x480] sm:$0xff] }
  0xac   :  { %1271 = vmatpush.msra.mxu2 %v786_v32  ;;  %1291 = vmatpush.msra.mxu3 %v818_v33  ;;  %v948_v29 = vld [vmem:[#allocation7 + $0x790] sm:$0xff]  ;;  %v882_v31 = vld [vmem:[#allocation7 + $0x580] sm:$0xff] }
  0xad   :  { %1232 = vmatpush.msra.mxu0 %v720_v34  ;;  %1252 = vmatpush.msra.mxu1 %v752_v35  ;;  %v914_v32 = vld [vmem:[#allocation7 + $0x680] sm:$0xff]  ;;  %v848_v34 = vld [vmem:[#allocation7 + $0x470] sm:$0xff] }
  0xae   :  { %1272 = vmatpush.msra.mxu2 %v784_v36  ;;  %1292 = vmatpush.msra.mxu3 %v816_v37  ;;  %v946_v33 = vld [vmem:[#allocation7 + $0x780] sm:$0xff]  ;;  %v880_v35 = vld [vmem:[#allocation7 + $0x570] sm:$0xff] }
  0xaf   :  { %1233 = vmatpush.msra.mxu0 %v718_v38  ;;  %1253 = vmatpush.msra.mxu1 %v750_v39  ;;  %v912_v36 = vld [vmem:[#allocation7 + $0x670] sm:$0xff]  ;;  %v846_v38 = vld [vmem:[#allocation7 + $0x460] sm:$0xff] }
  0xb0   :  { %1273 = vmatpush.msra.mxu2 %v782_v41  ;;  %1293 = vmatpush.msra.mxu3 %v814_v42  ;;  %v944_v37 = vld [vmem:[#allocation7 + $0x770] sm:$0xff]  ;;  %v878_v39 = vld [vmem:[#allocation7 + $0x560] sm:$0xff] }
  0xb1   :  { %1234 = vmatpush.msra.mxu0 %v716_v43  ;;  %1254 = vmatpush.msra.mxu1 %v748_v44  ;;  %v910_v41 = vld [vmem:[#allocation7 + $0x660] sm:$0xff]  ;;  %v844_v43 = vld [vmem:[#allocation7 + $0x450] sm:$0xff] }
  0xb2   :  { %1274 = vmatpush.msra.mxu2 %v780_v45  ;;  %1294 = vmatpush.msra.mxu3 %v812_v46  ;;  %v942_v42 = vld [vmem:[#allocation7 + $0x760] sm:$0xff]  ;;  %v876_v44 = vld [vmem:[#allocation7 + $0x550] sm:$0xff] }
  0xb3   :  { %1235 = vmatpush.msra.mxu0 %v714_v47  ;;  %1255 = vmatpush.msra.mxu1 %v746_v48  ;;  %v2086_v45 = vld [vmem:[#allocation8] sm:$0xff]  ;;  %v908_v46 = vld [vmem:[#allocation7 + $0x650] sm:$0xff] }
  0xb4   :  { %1275 = vmatpush.msra.mxu2 %v778_v49  ;;  %1295 = vmatpush.msra.mxu3 %v810_v50  ;;  %v940_v47 = vld [vmem:[#allocation7 + $0x750] sm:$0xff]  ;;  %v842_v48 = vld [vmem:[#allocation7 + $0x440] sm:$0xff] }
  0xb5   :  { %1236 = vmatpush.msra.mxu0 %v712_v51  ;;  %1256 = vmatpush.msra.mxu1 %v744_v52  ;;  %v874_v49 = vld [vmem:[#allocation7 + $0x540] sm:$0xff]  ;;  %v338_v52 = vperm.slane %v2086_v45, 0 }
  0xb6   :  { %1276 = vmatpush.msra.mxu2 %v776_v53  ;;  %1296 = vmatpush.msra.mxu3 %v808_v54  ;;  %v906_v50 = vld [vmem:[#allocation7 + $0x640] sm:$0xff]  ;;  %v339_v53 = vperm.slane %v2086_v45, 1  ;;  %v840_v54 = vld [vmem:[#allocation7 + $0x430] sm:$0xff] }
  0xb7   :  { %1237 = vmatpush.msra.mxu0 %v710_v55  ;;  %1257 = vmatpush.msra.mxu1 %v742_v56  ;;  %v938_v51 = vld [vmem:[#allocation7 + $0x740] sm:$0xff]  ;;  %v872_v55 = vld [vmem:[#allocation7 + $0x530] sm:$0xff] }
  0xb8   :  { %1277 = vmatpush.msra.mxu2 %v774_v57  ;;  %1297 = vmatpush.msra.mxu3 %v806_v58  ;;  %v340_v58 = vperm.slane %v2086_v45, 2 }
  0xb9   :  { %1238 = vmatpush.msra.mxu0 %v708_v59  ;;  %1258 = vmatpush.msra.mxu1 %v740_v60  ;;  %v341_v59 = vperm.slane %v2086_v45, 3  ;;  %v904_v60 = vld [vmem:[#allocation7 + $0x630] sm:$0xff] }
  0xba   :  { %1278 = vmatpush.msra.mxu2 %v772_v61  ;;  %1298 = vmatpush.msra.mxu3 %v804_v62  ;;  %v936_v61 = vld [vmem:[#allocation7 + $0x730] sm:$0xff] }
  0xbb   :  { %1239 = vmatpush.msra.mxu0 %v706_v63  ;;  %1259 = vmatpush.msra.mxu1 %v738_v0  ;;  %v838_v0 = vld [vmem:[#allocation7 + $0x420] sm:$0xff] }
  0xbc   :  { %1279 = vmatpush.msra.mxu2 %v770_v1  ;;  %1299 = vmatpush.msra.mxu3 %v802_v2  ;;  %v870_v1 = vld [vmem:[#allocation7 + $0x520] sm:$0xff] }
  0xbd   :  { %1304 = vmatpush.msrb.mxu0 %v864_v3  ;;  %1324 = vmatpush.msrb.mxu1 %v896_v4  ;;  %v902_v4 = vld [vmem:[#allocation7 + $0x620] sm:$0xff] }
  0xbe   :  { %1344 = vmatpush.msrb.mxu2 %v928_v5  ;;  %1364 = vmatpush.msrb.mxu3 %v960_v6  ;;  %v934_v5 = vld [vmem:[#allocation7 + $0x720] sm:$0xff] }
  0xbf   :  { %1305 = vmatpush.msrb.mxu0 %v862_v7  ;;  %1325 = vmatpush.msrb.mxu1 %v894_v8  ;;  %v836_v8 = vld [vmem:[#allocation7 + $0x410] sm:$0xff] }
  0xc0   :  { %1345 = vmatpush.msrb.mxu2 %v926_v9  ;;  %1365 = vmatpush.msrb.mxu3 %v958_v10  ;;  %v868_v9 = vld [vmem:[#allocation7 + $0x510] sm:$0xff] }
  0xc1   :  { %1306 = vmatpush.msrb.mxu0 %v860_v11  ;;  %1326 = vmatpush.msrb.mxu1 %v892_v12  ;;  %v900_v10 = vld [vmem:[#allocation7 + $0x610] sm:$0xff]  ;;  %v834_v12 = vld [vmem:[#allocation7 + $0x400] sm:$0xff] }
  0xc2   :  { %1346 = vmatpush.msrb.mxu2 %v924_v13  ;;  %1366 = vmatpush.msrb.mxu3 %v956_v14  ;;  %v932_v11 = vld [vmem:[#allocation7 + $0x710] sm:$0xff]  ;;  %v866_v13 = vld [vmem:[#allocation7 + $0x500] sm:$0xff] }
  0xc3   :  { %1307 = vmatpush.msrb.mxu0 %v858_v15  ;;  %1327 = vmatpush.msrb.mxu1 %v890_v16  ;;  %v898_v16 = vld [vmem:[#allocation7 + $0x600] sm:$0xff] }
  0xc4   :  { %1347 = vmatpush.msrb.mxu2 %v922_v17  ;;  %1367 = vmatpush.msrb.mxu3 %v954_v18  ;;  %v930_v17 = vld [vmem:[#allocation7 + $0x700] sm:$0xff] }
  0xc5   :  { %1308 = vmatpush.msrb.mxu0 %v856_v19  ;;  %1328 = vmatpush.msrb.mxu1 %v888_v20  ;;  %v992_v20 = vld [vmem:[#allocation7 + $0x8f0] sm:$0xff] }
  0xc6   :  { %1348 = vmatpush.msrb.mxu2 %v920_v40  ;;  %1368 = vmatpush.msrb.mxu3 %v952_v21  ;;  %v1024_v40 = vld [vmem:[#allocation7 + $0x9f0] sm:$0xff] }
  0xc7   :  { %1309 = vmatpush.msrb.mxu0 %v854_v22  ;;  %1329 = vmatpush.msrb.mxu1 %v886_v23  ;;  %v1056_v21 = vld [vmem:[#allocation7 + $0xaf0] sm:$0xff]  ;;  %v342_v23 = vperm.slane %v2086_v45, 4 }
  0xc8   :  { %1349 = vmatpush.msrb.mxu2 %v918_v24  ;;  %1369 = vmatpush.msrb.mxu3 %v950_v25  ;;  %v1088_v22 = vld [vmem:[#allocation7 + $0xbf0] sm:$0xff]  ;;  %v990_v24 = vld [vmem:[#allocation7 + $0x8e0] sm:$0xff] }
  0xc9   :  { %1310 = vmatpush.msrb.mxu0 %v852_v26  ;;  %1330 = vmatpush.msrb.mxu1 %v884_v27  ;;  %v1022_v25 = vld [vmem:[#allocation7 + $0x9e0] sm:$0xff] }
  0xca   :  { %1350 = vmatpush.msrb.mxu2 %v916_v28  ;;  %1370 = vmatpush.msrb.mxu3 %v948_v29  ;;  %v1054_v27 = vld [vmem:[#allocation7 + $0xae0] sm:$0xff]  ;;  %v343_v29 = vperm.slane %v2086_v45, 5 }
  0xcb   :  { %1311 = vmatpush.msrb.mxu0 %v850_v30  ;;  %1331 = vmatpush.msrb.mxu1 %v882_v31  ;;  %v1086_v28 = vld [vmem:[#allocation7 + $0xbe0] sm:$0xff]  ;;  %v988_v30 = vld [vmem:[#allocation7 + $0x8d0] sm:$0xff] }
  0xcc   :  { %1351 = vmatpush.msrb.mxu2 %v914_v32  ;;  %1371 = vmatpush.msrb.mxu3 %v946_v33  ;;  %v427_v62 = vpop.f32.mrf.mxu2  ;;  %v447_v63 = vpop.f32.mrf.mxu3  ;;  %v1020_v31 = vld [vmem:[#allocation7 + $0x9d0] sm:$0xff]  ;;  %v344_v33 = vperm.slane %v2086_v45, 6 }
  0xcd   :  { %1312 = vmatpush.msrb.mxu0 %v848_v34  ;;  %1332 = vmatpush.msrb.mxu1 %v880_v35  ;;  %v387_v56 = vpop.f32.mrf.mxu0  ;;  %v407_v57 = vpop.f32.mrf.mxu1  ;;  %v2096_v6 = vadd.f32 %v427_v62, %v340_v58  ;;  %v2098_v7 = vadd.f32 %v447_v63, %v341_v59  ;;  %v1052_v34 = vld [vmem:[#allocation7 + $0xad0] sm:$0xff]  ;;  %v1078_v58 = vld [vmem:[#allocation7 + $0xba0] sm:$0xff] }
  0xce   :  { %1352 = vmatpush.msrb.mxu2 %v912_v36  ;;  %1372 = vmatpush.msrb.mxu3 %v944_v37  ;;  %v2092_v2 = vadd.f32 %v387_v56, %v338_v52  ;;  %v2094_v3 = vadd.f32 %v407_v57, %v339_v53  ;;  %v1084_v35 = vld [vmem:[#allocation7 + $0xbd0] sm:$0xff]  ;;  %v1014_v53 = vld [vmem:[#allocation7 + $0x9a0] sm:$0xff] }
  0xcf   :  { %1313 = vmatpush.msrb.mxu0 %v846_v38  ;;  %1333 = vmatpush.msrb.mxu1 %v878_v39  ;;  %v692_v18 = vmax.f32 %v2096_v6, 0.0  ;;  %v693_v19 = vmax.f32 %v2098_v7, 0.0  ;;  %v986_v38 = vld [vmem:[#allocation7 + $0x8c0] sm:$0xff]  ;;  %v1080_v52 = vld [vmem:[#allocation7 + $0xbb0] sm:$0xff]  ;;  %v859_v6 = vld [vmem:[#allocation7 + $0x4c8] sm:$0xff] }
  0xd0   :  { %1353 = vmatpush.msrb.mxu2 %v910_v41  ;;  %1373 = vmatpush.msrb.mxu3 %v942_v42  ;;  %v690_v14 = vmax.f32 %v2092_v2, 0.0  ;;  %v691_v15 = vmax.f32 %v2094_v3, 0.0  ;;  %v1018_v39 = vld [vmem:[#allocation7 + $0x9c0] sm:$0xff]  ;;  %v980_v59 = vld [vmem:[#allocation7 + $0x890] sm:$0xff]  ;;  %v861_v2 = vld [vmem:[#allocation7 + $0x4d8] sm:$0xff] }
  0xd1   :  { %1314 = vmatpush.msrb.mxu0 %v844_v43  ;;  %1334 = vmatpush.msrb.mxu1 %v876_v44  ;;  %v1050_v41 = vld [vmem:[#allocation7 + $0xac0] sm:$0xff]  ;;  %v345_v44 = vperm.slane %v2086_v45, 7  ;;  %v1076_v63 = vld [vmem:[#allocation7 + $0xb90] sm:$0xff]  ;;  %v925_v3 = vld [vmem:[#allocation7 + $0x6d8] sm:$0xff] }
  0xd2   :  { %1354 = vmatpush.msrb.mxu2 %v908_v46  ;;  %1374 = vmatpush.msrb.mxu3 %v940_v47  ;;  %v1082_v42 = vld [vmem:[#allocation7 + $0xbc0] sm:$0xff]  ;;  %v984_v47 = vld [vmem:[#allocation7 + $0x8b0] sm:$0xff]  ;;  %v923_v7 = vld [vmem:[#allocation7 + $0x6c8] sm:$0xff] }
  0xd3   :  { %1315 = vmatpush.msrb.mxu0 %v842_v48  ;;  %1335 = vmatpush.msrb.mxu1 %v874_v49  ;;  %v1016_v48 = vld [vmem:[#allocation7 + $0x9b0] sm:$0xff]  ;;  %v1046_v56 = vld [vmem:[#allocation7 + $0xaa0] sm:$0xff] }
  0xd4   :  { %1355 = vmatpush.msrb.mxu2 %v906_v50  ;;  %1375 = vmatpush.msrb.mxu3 %v938_v51  ;;  %v1048_v51 = vld [vmem:[#allocation7 + $0xab0] sm:$0xff] }
  0xd5   :  { %1316 = vmatpush.msrb.mxu0 %v840_v54  ;;  %1336 = vmatpush.msrb.mxu1 %v872_v55  ;;  %v982_v55 = vld [vmem:[#allocation7 + $0x8a0] sm:$0xff] }
  0xd6   :  { %1356 = vmatpush.msrb.mxu2 %v904_v60  ;;  %1376 = vmatpush.msrb.mxu3 %v936_v61  ;;  %v1012_v60 = vld [vmem:[#allocation7 + $0x990] sm:$0xff] }
  0xd7   :  { %1317 = vmatpush.msrb.mxu0 %v838_v0  ;;  %1337 = vmatpush.msrb.mxu1 %v870_v1  ;;  %v1044_v61 = vld [vmem:[#allocation7 + $0xa90] sm:$0xff]  ;;  %v978_v0 = vld [vmem:[#allocation7 + $0x880] sm:$0xff] }
  0xd8   :  { %1357 = vmatpush.msrb.mxu2 %v902_v4  ;;  %1377 = vmatpush.msrb.mxu3 %v934_v5  ;;  %v1010_v1 = vld [vmem:[#allocation7 + $0x980] sm:$0xff] }
  0xd9   :  { %1318 = vmatpush.msrb.mxu0 %v836_v8  ;;  %1338 = vmatpush.msrb.mxu1 %v868_v9  ;;  %v467_v26 = vpop.f32.mrf.mxu0  ;;  %v1042_v4 = vld [vmem:[#allocation7 + $0xa80] sm:$0xff]  ;;  %v976_v8 = vld [vmem:[#allocation7 + $0x870] sm:$0xff] }
  0xda   :  { %1358 = vmatpush.msrb.mxu2 %v900_v10  ;;  %1378 = vmatpush.msrb.mxu3 %v932_v11  ;;  %v2115_v36 = vadd.f32 %v467_v26, %v342_v23  ;;  %v507_v37 = vpop.f32.mrf.mxu2  ;;  %v1074_v5 = vld [vmem:[#allocation7 + $0xb80] sm:$0xff]  ;;  %v1008_v9 = vld [vmem:[#allocation7 + $0x970] sm:$0xff] }
  0xdb   :  { %1319 = vmatpush.msrb.mxu0 %v834_v12  ;;  %1339 = vmatpush.msrb.mxu1 %v866_v13  ;;  %v487_v32 = vpop.f32.mrf.mxu1  ;;  %v2120_v46 = vadd.f32 %v507_v37, %v344_v33  ;;  %v1040_v10 = vld [vmem:[#allocation7 + $0xa70] sm:$0xff]  ;;  %v974_v12 = vld [vmem:[#allocation7 + $0x860] sm:$0xff]  ;;  %v2136_v33 = vld [vmem:[#allocation8 + $0x8] sm:$0xff] }
  0xdc   :  { %1359 = vmatpush.msrb.mxu2 %v898_v16  ;;  %1379 = vmatpush.msrb.mxu3 %v930_v17  ;;  %v2117_v43 = vadd.f32 %v487_v32, %v343_v29  ;;  %v694_v50 = vmax.f32 %v2115_v36, 0.0  ;;  %v1072_v11 = vld [vmem:[#allocation7 + $0xb70] sm:$0xff]  ;;  %v1006_v13 = vld [vmem:[#allocation7 + $0x960] sm:$0xff]  ;;  %v989_v36 = vld [vmem:[#allocation7 + $0x8d8] sm:$0xff] }
  0xdd   :  { %1240 = vmatmul.f32.vlgmr.msra.gmra.mxu0 %v690_v14  ;;  %1260 = vmatmul.f32.vlgmr.msra.gmra.mxu1 %v691_v15  ;;  %v527_v49 = vpop.f32.mrf.mxu3  ;;  %v696_v57 = vmax.f32 %v2120_v46, 0.0  ;;  %v1038_v16 = vld [vmem:[#allocation7 + $0xa60] sm:$0xff]  ;;  %v1032_v29 = vld [vmem:[#allocation7 + $0xa30] sm:$0xff]  ;;  %v987_v46 = vld [vmem:[#allocation7 + $0x8c8] sm:$0xff] }
  0xde   :  { %1280 = vmatmul.f32.vlgmr.msra.gmra.mxu2 %v692_v18  ;;  %1300 = vmatmul.f32.vlgmr.msra.gmra.mxu3 %v693_v19  ;;  %v695_v54 = vmax.f32 %v2117_v43, 0.0  ;;  %v2124_v45 = vadd.f32 %v527_v49, %v345_v44  ;;  %v1070_v17 = vld [vmem:[#allocation7 + $0xb60] sm:$0xff]  ;;  %v964_v37 = vld [vmem:[#allocation7 + $0x810] sm:$0xff]  ;;  %v1053_v43 = vld [vmem:[#allocation7 + $0xad8] sm:$0xff] }
  0xdf   :  { %1384 = vmatpush.msra.mxu0 %v992_v20  ;;  %1404 = vmatpush.msra.mxu1 %v1024_v40  ;;  %v972_v20 = vld [vmem:[#allocation7 + $0x850] sm:$0xff]  ;;  %v970_v23 = vld [vmem:[#allocation7 + $0x840] sm:$0xff] }
  0xe0   :  { %1424 = vmatpush.msra.mxu2 %v1056_v21  ;;  %1444 = vmatpush.msra.mxu3 %v1088_v22  ;;  %v697_v62 = vmax.f32 %v2124_v45, 0.0  ;;  %v1004_v40 = vld [vmem:[#allocation7 + $0x950] sm:$0xff]  ;;  %v1066_v26 = vld [vmem:[#allocation7 + $0xb40] sm:$0xff]  ;;  %v1051_v45 = vld [vmem:[#allocation7 + $0xac8] sm:$0xff] }
  0xe1   :  { %1385 = vmatpush.msra.mxu0 %v990_v24  ;;  %1405 = vmatpush.msra.mxu1 %v1022_v25  ;;  %v1036_v21 = vld [vmem:[#allocation7 + $0xa50] sm:$0xff]  ;;  %v1002_v24 = vld [vmem:[#allocation7 + $0x940] sm:$0xff] }
  0xe2   :  { %1425 = vmatpush.msra.mxu2 %v1054_v27  ;;  %1445 = vmatpush.msra.mxu3 %v1086_v28  ;;  %v1068_v22 = vld [vmem:[#allocation7 + $0xb50] sm:$0xff]  ;;  %v1034_v25 = vld [vmem:[#allocation7 + $0xa40] sm:$0xff] }
  0xe3   :  { %1386 = vmatpush.msra.mxu0 %v988_v30  ;;  %1406 = vmatpush.msra.mxu1 %v1020_v31  ;;  %v968_v27 = vld [vmem:[#allocation7 + $0x830] sm:$0xff]  ;;  %v966_v31 = vld [vmem:[#allocation7 + $0x820] sm:$0xff] }
  0xe4   :  { %1426 = vmatpush.msra.mxu2 %v1052_v34  ;;  %1446 = vmatpush.msra.mxu3 %v1084_v35  ;;  %v1000_v28 = vld [vmem:[#allocation7 + $0x930] sm:$0xff]  ;;  %v998_v32 = vld [vmem:[#allocation7 + $0x920] sm:$0xff] }
  0xe5   :  { %1387 = vmatpush.msra.mxu0 %v986_v38  ;;  %1407 = vmatpush.msra.mxu1 %v1018_v39  ;;  %v1064_v30 = vld [vmem:[#allocation7 + $0xb30] sm:$0xff]  ;;  %v1030_v34 = vld [vmem:[#allocation7 + $0xa20] sm:$0xff] }
  0xe6   :  { %1427 = vmatpush.msra.mxu2 %v1050_v41  ;;  %1447 = vmatpush.msra.mxu3 %v1082_v42  ;;  %v1062_v35 = vld [vmem:[#allocation7 + $0xb20] sm:$0xff]  ;;  %v996_v38 = vld [vmem:[#allocation7 + $0x910] sm:$0xff]  ;;  %v346_v42 = vperm.slane %v2136_v33, 0 }
  0xe7   :  { %1388 = vmatpush.msra.mxu0 %v984_v47  ;;  %1408 = vmatpush.msra.mxu1 %v1016_v48  ;;  %v1028_v39 = vld [vmem:[#allocation7 + $0xa10] sm:$0xff]  ;;  %v962_v44 = vld [vmem:[#allocation7 + $0x800] sm:$0xff] }
  0xe8   :  { %1428 = vmatpush.msra.mxu2 %v1048_v51  ;;  %1448 = vmatpush.msra.mxu3 %v1080_v52  ;;  %v1060_v41 = vld [vmem:[#allocation7 + $0xb10] sm:$0xff]  ;;  %v994_v47 = vld [vmem:[#allocation7 + $0x900] sm:$0xff]  ;;  %v347_v52 = vperm.slane %v2136_v33, 1 }
  0xe9   :  { %1320 = vmatmul.f32.vlgmr.msrb.gmra.mxu0 %v694_v50  ;;  %1409 = vmatpush.msra.mxu1 %v1014_v53  ;;  %v1026_v49 = vld [vmem:[#allocation7 + $0xa00] sm:$0xff]  ;;  %v1120_v53 = vld [vmem:[#allocation7 + $0xcf0] sm:$0xff] }
  0xea   :  { %1389 = vmatpush.msra.mxu0 %v982_v55  ;;  %1429 = vmatpush.msra.mxu2 %v1046_v56  ;;  %v1058_v51 = vld [vmem:[#allocation7 + $0xb00] sm:$0xff]  ;;  %v1152_v55 = vld [vmem:[#allocation7 + $0xdf0] sm:$0xff] }
  0xeb   :  { %1449 = vmatpush.msra.mxu3 %v1078_v58  ;;  %1340 = vmatmul.f32.vlgmr.msrb.gmra.mxu1 %v695_v54  ;;  %v1184_v58 = vld [vmem:[#allocation7 + $0xef0] sm:$0xff] }
  0xec   :  { %1360 = vmatmul.f32.vlgmr.msrb.gmra.mxu2 %v696_v57  ;;  %1390 = vmatpush.msra.mxu0 %v980_v59  ;;  %v1216_v59 = vld [vmem:[#allocation7 + $0xff0] sm:$0xff] }
  0xed   :  { %1410 = vmatpush.msra.mxu1 %v1012_v60  ;;  %1430 = vmatpush.msra.mxu2 %v1044_v61  ;;  %v1118_v61 = vld [vmem:[#allocation7 + $0xce0] sm:$0xff] }
  0xee   :  { %1450 = vmatpush.msra.mxu3 %v1076_v63  ;;  %1391 = vmatpush.msra.mxu0 %v978_v0  ;;  %v1150_v63 = vld [vmem:[#allocation7 + $0xde0] sm:$0xff] }
  0xef   :  { %1380 = vmatmul.f32.vlgmr.msrb.gmra.mxu3 %v697_v62  ;;  %1411 = vmatpush.msra.mxu1 %v1010_v1  ;;  %v1182_v0 = vld [vmem:[#allocation7 + $0xee0] sm:$0xff] }
  0xf0   :  { %1431 = vmatpush.msra.mxu2 %v1042_v4  ;;  %1451 = vmatpush.msra.mxu3 %v1074_v5  ;;  %v1214_v1 = vld [vmem:[#allocation7 + $0xfe0] sm:$0xff]  ;;  %v1116_v5 = vld [vmem:[#allocation7 + $0xcd0] sm:$0xff] }
  0xf1   :  { %1392 = vmatpush.msra.mxu0 %v976_v8  ;;  %1412 = vmatpush.msra.mxu1 %v1008_v9  ;;  %v1148_v8 = vld [vmem:[#allocation7 + $0xdd0] sm:$0xff]  ;;  %v348_v9 = vperm.slane %v2136_v33, 2 }
  0xf2   :  { %1432 = vmatpush.msra.mxu2 %v1040_v10  ;;  %1452 = vmatpush.msra.mxu3 %v1072_v11  ;;  %v1180_v11 = vld [vmem:[#allocation7 + $0xed0] sm:$0xff] }
  0xf3   :  { %1393 = vmatpush.msra.mxu0 %v974_v12  ;;  %1413 = vmatpush.msra.mxu1 %v1006_v13  ;;  %v1212_v12 = vld [vmem:[#allocation7 + $0xfd0] sm:$0xff] }
  0xf4   :  { %1433 = vmatpush.msra.mxu2 %v1038_v16  ;;  %1453 = vmatpush.msra.mxu3 %v1070_v17  ;;  %v1146_v16 = vld [vmem:[#allocation7 + $0xdc0] sm:$0xff] }
  0xf5   :  { %1394 = vmatpush.msra.mxu0 %v972_v20  ;;  %1414 = vmatpush.msra.mxu1 %v1004_v40  ;;  %v1114_v20 = vld [vmem:[#allocation7 + $0xcc0] sm:$0xff] }
  0xf6   :  { %1434 = vmatpush.msra.mxu2 %v1036_v21  ;;  %1454 = vmatpush.msra.mxu3 %v1068_v22  ;;  %v547_v48 = vpop.f32.mrf.mxu0  ;;  %v1178_v40 = vld [vmem:[#allocation7 + $0xec0] sm:$0xff]  ;;  %v349_v21 = vperm.slane %v2136_v33, 3 }
  0xf7   :  { %1395 = vmatpush.msra.mxu0 %v970_v23  ;;  %1415 = vmatpush.msra.mxu1 %v1002_v24  ;;  %v2140_v60 = vadd.f32 %v547_v48, %v346_v42  ;;  %v1210_v22 = vld [vmem:[#allocation7 + $0xfc0] sm:$0xff]  ;;  %v1204_v42 = vld [vmem:[#allocation7 + $0xf90] sm:$0xff] }
  0xf8   :  { %1435 = vmatpush.msra.mxu2 %v1034_v25  ;;  %1455 = vmatpush.msra.mxu3 %v1066_v26  ;;  %v1112_v25 = vld [vmem:[#allocation7 + $0xcb0] sm:$0xff]  ;;  %v1170_v48 = vld [vmem:[#allocation7 + $0xe80] sm:$0xff] }
  0xf9   :  { %1396 = vmatpush.msra.mxu0 %v968_v27  ;;  %1416 = vmatpush.msra.mxu1 %v1000_v28  ;;  %v567_v56 = vpop.f32.mrf.mxu1  ;;  %v698_v10 = vmax.f32 %v2140_v60, 0.0  ;;  %v1144_v26 = vld [vmem:[#allocation7 + $0xdb0] sm:$0xff]  ;;  %v1215_v60 = vld [vmem:[#allocation7 + $0xfe8] sm:$0xff] }
  0xfa   :  { %1436 = vmatpush.msra.mxu2 %v1032_v29  ;;  %1456 = vmatpush.msra.mxu3 %v1064_v30  ;;  %v2142_v4 = vadd.f32 %v567_v56, %v347_v52  ;;  %v1176_v27 = vld [vmem:[#allocation7 + $0xeb0] sm:$0xff]  ;;  %v1110_v30 = vld [vmem:[#allocation7 + $0xca0] sm:$0xff] }
  0xfb   :  { %1397 = vmatpush.msra.mxu0 %v966_v31  ;;  %1417 = vmatpush.msra.mxu1 %v998_v32  ;;  %v1208_v28 = vld [vmem:[#allocation7 + $0xfb0] sm:$0xff]  ;;  %v1142_v31 = vld [vmem:[#allocation7 + $0xda0] sm:$0xff] }
  0xfc   :  { %1437 = vmatpush.msra.mxu2 %v1030_v34  ;;  %1457 = vmatpush.msra.mxu3 %v1062_v35  ;;  %v587_v13 = vpop.f32.mrf.mxu2  ;;  %v699_v17 = vmax.f32 %v2142_v4, 0.0  ;;  %v1174_v34 = vld [vmem:[#allocation7 + $0xea0] sm:$0xff]  ;;  %v1136_v52 = vld [vmem:[#allocation7 + $0xd70] sm:$0xff]  ;;  %v1117_v4 = vld [vmem:[#allocation7 + $0xcd8] sm:$0xff] }
  0xfd   :  { %1398 = vmatpush.msra.mxu0 %v964_v37  ;;  %1418 = vmatpush.msra.mxu1 %v996_v38  ;;  %v2148_v23 = vadd.f32 %v587_v13, %v348_v9  ;;  %v1206_v35 = vld [vmem:[#allocation7 + $0xfa0] sm:$0xff]  ;;  %v1108_v37 = vld [vmem:[#allocation7 + $0xc90] sm:$0xff] }
  0xfe   :  { %1438 = vmatpush.msra.mxu2 %v1028_v39  ;;  %1458 = vmatpush.msra.mxu3 %v1060_v41  ;;  %v1140_v38 = vld [vmem:[#allocation7 + $0xd90] sm:$0xff]  ;;  %v1102_v56 = vld [vmem:[#allocation7 + $0xc60] sm:$0xff] }
  0xff   :  { %1399 = vmatpush.msra.mxu0 %v962_v44  ;;  %1419 = vmatpush.msra.mxu1 %v994_v47  ;;  %v607_v24 = vpop.f32.mrf.mxu3  ;;  %v700_v32 = vmax.f32 %v2148_v23, 0.0  ;;  %v1172_v39 = vld [vmem:[#allocation7 + $0xe90] sm:$0xff]  ;;  %v1106_v44 = vld [vmem:[#allocation7 + $0xc80] sm:$0xff] }
 0x100   :  { %1439 = vmatpush.msra.mxu2 %v1026_v49  ;;  %1459 = vmatpush.msra.mxu3 %v1058_v51  ;;  %v2154_v29 = vadd.f32 %v607_v24, %v349_v21  ;;  %v1138_v47 = vld [vmem:[#allocation7 + $0xd80] sm:$0xff]  ;;  %v1104_v51 = vld [vmem:[#allocation7 + $0xc70] sm:$0xff] }
 0x101   :  { %1464 = vmatpush.msrb.mxu0 %v1120_v53  ;;  %1484 = vmatpush.msrb.mxu1 %v1152_v55  ;;  %v1202_v49 = vld [vmem:[#allocation7 + $0xf80] sm:$0xff]  ;;  %v1168_v53 = vld [vmem:[#allocation7 + $0xe70] sm:$0xff] }
 0x102   :  { %1504 = vmatpush.msrb.mxu2 %v1184_v58  ;;  %1524 = vmatpush.msrb.mxu3 %v1216_v59  ;;  %v701_v41 = vmax.f32 %v2154_v29, 0.0  ;;  %v1200_v55 = vld [vmem:[#allocation7 + $0xf70] sm:$0xff]  ;;  %v1134_v58 = vld [vmem:[#allocation7 + $0xd60] sm:$0xff]  ;;  %v1115_v29 = vld [vmem:[#allocation7 + $0xcc8] sm:$0xff] }
 0x103   :  { %1465 = vmatpush.msrb.mxu0 %v1118_v61  ;;  %1485 = vmatpush.msrb.mxu1 %v1150_v63  ;;  %v1166_v59 = vld [vmem:[#allocation7 + $0xe60] sm:$0xff]  ;;  %v1100_v63 = vld [vmem:[#allocation7 + $0xc50] sm:$0xff] }
 0x104   :  { %1505 = vmatpush.msrb.mxu2 %v1182_v0  ;;  %1525 = vmatpush.msrb.mxu3 %v1214_v1  ;;  %v1198_v61 = vld [vmem:[#allocation7 + $0xf60] sm:$0xff]  ;;  %v1132_v0 = vld [vmem:[#allocation7 + $0xd50] sm:$0xff] }
 0x105   :  { %1466 = vmatpush.msrb.mxu0 %v1116_v5  ;;  %1486 = vmatpush.msrb.mxu1 %v1148_v8  ;;  %v1164_v1 = vld [vmem:[#allocation7 + $0xe50] sm:$0xff]  ;;  %v1098_v8 = vld [vmem:[#allocation7 + $0xc40] sm:$0xff] }
 0x106   :  { %1506 = vmatpush.msrb.mxu2 %v1180_v11  ;;  %1526 = vmatpush.msrb.mxu3 %v1212_v12  ;;  %v1196_v5 = vld [vmem:[#allocation7 + $0xf50] sm:$0xff]  ;;  %v1130_v9 = vld [vmem:[#allocation7 + $0xd40] sm:$0xff] }
 0x107   :  { %1400 = vmatmul.f32.vlgmr.msra.gmra.mxu0 %v698_v10  ;;  %1487 = vmatpush.msrb.mxu1 %v1146_v16  ;;  %v1162_v11 = vld [vmem:[#allocation7 + $0xe40] sm:$0xff]  ;;  %v1096_v13 = vld [vmem:[#allocation7 + $0xc30] sm:$0xff] }
 0x108   :  { %1467 = vmatpush.msrb.mxu0 %v1114_v20  ;;  %1507 = vmatpush.msrb.mxu2 %v1178_v40  ;;  %v1194_v12 = vld [vmem:[#allocation7 + $0xf40] sm:$0xff]  ;;  %v1128_v16 = vld [vmem:[#allocation7 + $0xd30] sm:$0xff] }
 0x109   :  { %1527 = vmatpush.msrb.mxu3 %v1210_v22  ;;  %1420 = vmatmul.f32.vlgmr.msra.gmra.mxu1 %v699_v17  ;;  %v1160_v20 = vld [vmem:[#allocation7 + $0xe30] sm:$0xff]  ;;  %v1094_v21 = vld [vmem:[#allocation7 + $0xc20] sm:$0xff] }
 0x10a   :  { %1468 = vmatpush.msrb.mxu0 %v1112_v25  ;;  %1488 = vmatpush.msrb.mxu1 %v1144_v26  ;;  %v1192_v40 = vld [vmem:[#allocation7 + $0xf30] sm:$0xff]  ;;  %v1126_v22 = vld [vmem:[#allocation7 + $0xd20] sm:$0xff] }
 0x10b   :  { %1508 = vmatpush.msrb.mxu2 %v1176_v27  ;;  %1528 = vmatpush.msrb.mxu3 %v1208_v28  ;;  %v1158_v24 = vld [vmem:[#allocation7 + $0xe20] sm:$0xff]  ;;  %v1092_v26 = vld [vmem:[#allocation7 + $0xc10] sm:$0xff] }
 0x10c   :  { %1469 = vmatpush.msrb.mxu0 %v1110_v30  ;;  %1489 = vmatpush.msrb.mxu1 %v1142_v31  ;;  %v1190_v25 = vld [vmem:[#allocation7 + $0xf20] sm:$0xff]  ;;  %v1124_v27 = vld [vmem:[#allocation7 + $0xd10] sm:$0xff]  ;;  %v350_v31 = vperm.slane %v2136_v33, 4 }
 0x10d   :  { %1509 = vmatpush.msrb.mxu2 %v1174_v34  ;;  %1529 = vmatpush.msrb.mxu3 %v1206_v35  ;;  %v1156_v28 = vld [vmem:[#allocation7 + $0xe10] sm:$0xff]  ;;  %v1090_v34 = vld [vmem:[#allocation7 + $0xc00] sm:$0xff] }
 0x10e   :  { %1440 = vmatmul.f32.vlgmr.msra.gmra.mxu2 %v700_v32  ;;  %1470 = vmatpush.msrb.mxu0 %v1108_v37  ;;  %v1188_v30 = vld [vmem:[#allocation7 + $0xf10] sm:$0xff]  ;;  %v1122_v35 = vld [vmem:[#allocation7 + $0xd00] sm:$0xff] }
 0x10f   :  { %1490 = vmatpush.msrb.mxu1 %v1140_v38  ;;  %1510 = vmatpush.msrb.mxu2 %v1172_v39  ;;  %v1154_v38 = vld [vmem:[#allocation7 + $0xe00] sm:$0xff] }
 0x110   :  { %1530 = vmatpush.msrb.mxu3 %v1204_v42  ;;  %1471 = vmatpush.msrb.mxu0 %v1106_v44  ;;  %v1186_v39 = vld [vmem:[#allocation7 + $0xf00] sm:$0xff]  ;;  %v351_v42 = vperm.slane %v2136_v33, 5  ;;  %v737_v44 = vld [vmem:[#allocation7 + $0xf8] sm:$0xff] }
 0x111   :  { %1460 = vmatmul.f32.vlgmr.msra.gmra.mxu3 %v701_v41  ;;  %1491 = vmatpush.msrb.mxu1 %v1138_v47  ;;  %v769_v47 = vld [vmem:[#allocation7 + $0x1f8] sm:$0xff] }
 0x112   :  { %1511 = vmatpush.msrb.mxu2 %v1170_v48  ;;  %1531 = vmatpush.msrb.mxu3 %v1202_v49  ;;  %v801_v49 = vld [vmem:[#allocation7 + $0x2f8] sm:$0xff] }
 0x113   :  { %1472 = vmatpush.msrb.mxu0 %v1104_v51  ;;  %1492 = vmatpush.msrb.mxu1 %v1136_v52  ;;  %v833_v51 = vld [vmem:[#allocation7 + $0x3f8] sm:$0xff] }
 0x114   :  { %1512 = vmatpush.msrb.mxu2 %v1168_v53  ;;  %1532 = vmatpush.msrb.mxu3 %v1200_v55  ;;  %v735_v53 = vld [vmem:[#allocation7 + $0xe8] sm:$0xff] }
 0x115   :  { %1473 = vmatpush.msrb.mxu0 %v1102_v56  ;;  %1493 = vmatpush.msrb.mxu1 %v1134_v58  ;;  %v767_v55 = vld [vmem:[#allocation7 + $0x1e8] sm:$0xff] }
 0x116   :  { %1513 = vmatpush.msrb.mxu2 %v1166_v59  ;;  %1533 = vmatpush.msrb.mxu3 %v1198_v61  ;;  %v799_v56 = vld [vmem:[#allocation7 + $0x2e8] sm:$0xff]  ;;  %v733_v61 = vld [vmem:[#allocation7 + $0xd8] sm:$0xff] }
 0x117   :  { %1474 = vmatpush.msrb.mxu0 %v1100_v63  ;;  %1494 = vmatpush.msrb.mxu1 %v1132_v0  ;;  %v831_v58 = vld [vmem:[#allocation7 + $0x3e8] sm:$0xff]  ;;  %v765_v63 = vld [vmem:[#allocation7 + $0x1d8] sm:$0xff]  ;;  %v352_v0 = vperm.slane %v2136_v33, 6 }
 0x118   :  { %1514 = vmatpush.msrb.mxu2 %v1164_v1  ;;  %1534 = vmatpush.msrb.mxu3 %v1196_v5  ;;  %v627_v37 = vpop.f32.mrf.mxu0  ;;  %v797_v5 = vld [vmem:[#allocation7 + $0x2d8] sm:$0xff] }
 0x119   :  { %1475 = vmatpush.msrb.mxu0 %v1098_v8  ;;  %1495 = vmatpush.msrb.mxu1 %v1130_v9  ;;  %v2164_v52 = vadd.f32 %v627_v37, %v350_v31  ;;  %v829_v8 = vld [vmem:[#allocation7 + $0x3d8] sm:$0xff] }
 0x11a   :  { %1515 = vmatpush.msrb.mxu2 %v1162_v11  ;;  %1535 = vmatpush.msrb.mxu3 %v1194_v12  ;;  %v763_v11 = vld [vmem:[#allocation7 + $0x1c8] sm:$0xff]  ;;  %v725_v37 = vld [vmem:[#allocation7 + $0x98] sm:$0xff] }
 0x11b   :  { %1476 = vmatpush.msrb.mxu0 %v1096_v13  ;;  %1496 = vmatpush.msrb.mxu1 %v1128_v16  ;;  %v647_v48 = vpop.f32.mrf.mxu1  ;;  %v702_v1 = vmax.f32 %v2164_v52, 0.0  ;;  %v731_v13 = vld [vmem:[#allocation7 + $0xc8] sm:$0xff] }
 0x11c   :  { %1516 = vmatpush.msrb.mxu2 %v1160_v20  ;;  %1536 = vmatpush.msrb.mxu3 %v1192_v40  ;;  %v2166_v59 = vadd.f32 %v647_v48, %v351_v42  ;;  %v795_v16 = vld [vmem:[#allocation7 + $0x2c8] sm:$0xff]  ;;  %v353_v20 = vperm.slane %v2136_v33, 7 }
 0x11d   :  { %1477 = vmatpush.msrb.mxu0 %v1094_v21  ;;  %1497 = vmatpush.msrb.mxu1 %v1126_v22  ;;  %v827_v40 = vld [vmem:[#allocation7 + $0x3c8] sm:$0xff] }
 0x11e   :  { %1517 = vmatpush.msrb.mxu2 %v1158_v24  ;;  %1537 = vmatpush.msrb.mxu3 %v1190_v25  ;;  %v667_v9 = vpop.f32.mrf.mxu2  ;;  %v703_v12 = vmax.f32 %v2166_v59, 0.0  ;;  %v729_v24 = vld [vmem:[#allocation7 + $0xb8] sm:$0xff]  ;;  %v755_v48 = vld [vmem:[#allocation7 + $0x188] sm:$0xff] }
 0x11f   :  { %1478 = vmatpush.msrb.mxu0 %v1092_v26  ;;  %1498 = vmatpush.msrb.mxu1 %v1124_v27  ;;  %v2172_v21 = vadd.f32 %v667_v9, %v352_v0  ;;  %v761_v25 = vld [vmem:[#allocation7 + $0x1b8] sm:$0xff]  ;;  %v783_v0 = vld [vmem:[#allocation7 + $0x268] sm:$0xff] }
 0x120   :  { %1518 = vmatpush.msrb.mxu2 %v1156_v28  ;;  %1538 = vmatpush.msrb.mxu3 %v1188_v30  ;;  %v793_v26 = vld [vmem:[#allocation7 + $0x2b8] sm:$0xff]  ;;  %v727_v28 = vld [vmem:[#allocation7 + $0xa8] sm:$0xff] }
 0x121   :  { %1479 = vmatpush.msrb.mxu0 %v1090_v34  ;;  %1499 = vmatpush.msrb.mxu1 %v1122_v35  ;;  %v687_v22 = vpop.f32.mrf.mxu3  ;;  %v825_v27 = vld [vmem:[#allocation7 + $0x3b8] sm:$0xff]  ;;  %v759_v30 = vld [vmem:[#allocation7 + $0x1a8] sm:$0xff]  ;;  %v704_v31 = vmax.f32 %v2172_v21, 0.0 }
 0x122   :  { %1519 = vmatpush.msrb.mxu2 %v1154_v38  ;;  %1539 = vmatpush.msrb.mxu3 %v1186_v39  ;;  %v2178_v33 = vadd.f32 %v687_v22, %v353_v20  ;;  %v791_v34 = vld [vmem:[#allocation7 + $0x2a8] sm:$0xff]  ;;  %v757_v38 = vld [vmem:[#allocation7 + $0x198] sm:$0xff] }
 0x123   :  { %1544 = vmatpush.msra.mxu0 %v737_v44  ;;  %1564 = vmatpush.msra.mxu1 %v769_v47  ;;  %v823_v35 = vld [vmem:[#allocation7 + $0x3a8] sm:$0xff]  ;;  %v789_v39 = vld [vmem:[#allocation7 + $0x298] sm:$0xff] }
 0x124   :  { %1584 = vmatpush.msra.mxu2 %v801_v49  ;;  %1604 = vmatpush.msra.mxu3 %v833_v51  ;;  %v705_v42 = vmax.f32 %v2178_v33, 0.0  ;;  %v821_v44 = vld [vmem:[#allocation7 + $0x398] sm:$0xff]  ;;  %v723_v47 = vld [vmem:[#allocation7 + $0x88] sm:$0xff] }
 0x125   :  { %1545 = vmatpush.msra.mxu0 %v735_v53  ;;  %1565 = vmatpush.msra.mxu1 %v767_v55  ;;  %v787_v49 = vld [vmem:[#allocation7 + $0x288] sm:$0xff]  ;;  %v721_v53 = vld [vmem:[#allocation7 + $0x78] sm:$0xff] }
 0x126   :  { %1585 = vmatpush.msra.mxu2 %v799_v56  ;;  %1605 = vmatpush.msra.mxu3 %v831_v58  ;;  %v819_v51 = vld [vmem:[#allocation7 + $0x388] sm:$0xff]  ;;  %v753_v55 = vld [vmem:[#allocation7 + $0x178] sm:$0xff] }
 0x127   :  { %1546 = vmatpush.msra.mxu0 %v733_v61  ;;  %1566 = vmatpush.msra.mxu1 %v765_v63  ;;  %v785_v56 = vld [vmem:[#allocation7 + $0x278] sm:$0xff]  ;;  %v719_v61 = vld [vmem:[#allocation7 + $0x68] sm:$0xff] }
 0x128   :  { %1586 = vmatpush.msra.mxu2 %v797_v5  ;;  %1606 = vmatpush.msra.mxu3 %v829_v8  ;;  %v817_v58 = vld [vmem:[#allocation7 + $0x378] sm:$0xff]  ;;  %v751_v63 = vld [vmem:[#allocation7 + $0x168] sm:$0xff] }
 0x129   :  { %1480 = vmatmul.f32.vlgmr.msrb.gmra.mxu0 %v702_v1  ;;  %1567 = vmatpush.msra.mxu1 %v763_v11  ;;  %v815_v5 = vld [vmem:[#allocation7 + $0x368] sm:$0xff]  ;;  %v717_v8 = vld [vmem:[#allocation7 + $0x58] sm:$0xff] }
 0x12a   :  { %1547 = vmatpush.msra.mxu0 %v731_v13  ;;  %1587 = vmatpush.msra.mxu2 %v795_v16  ;;  %v749_v9 = vld [vmem:[#allocation7 + $0x158] sm:$0xff]  ;;  %v715_v16 = vld [vmem:[#allocation7 + $0x48] sm:$0xff] }
 0x12b   :  { %1607 = vmatpush.msra.mxu3 %v827_v40  ;;  %1500 = vmatmul.f32.vlgmr.msrb.gmra.mxu1 %v703_v12  ;;  %v781_v11 = vld [vmem:[#allocation7 + $0x258] sm:$0xff]  ;;  %v747_v20 = vld [vmem:[#allocation7 + $0x148] sm:$0xff] }
 0x12c   :  { %1548 = vmatpush.msra.mxu0 %v729_v24  ;;  %1568 = vmatpush.msra.mxu1 %v761_v25  ;;  %v813_v13 = vld [vmem:[#allocation7 + $0x358] sm:$0xff]  ;;  %v779_v40 = vld [vmem:[#allocation7 + $0x248] sm:$0xff] }
 0x12d   :  { %1588 = vmatpush.msra.mxu2 %v793_v26  ;;  %1608 = vmatpush.msra.mxu3 %v825_v27  ;;  %v811_v22 = vld [vmem:[#allocation7 + $0x348] sm:$0xff]  ;;  %v713_v24 = vld [vmem:[#allocation7 + $0x38] sm:$0xff] }
 0x12e   :  { %1549 = vmatpush.msra.mxu0 %v727_v28  ;;  %1569 = vmatpush.msra.mxu1 %v759_v30  ;;  %v745_v25 = vld [vmem:[#allocation7 + $0x138] sm:$0xff]  ;;  %v711_v28 = vld [vmem:[#allocation7 + $0x28] sm:$0xff] }
 0x12f   :  { %1589 = vmatpush.msra.mxu2 %v791_v34  ;;  %1609 = vmatpush.msra.mxu3 %v823_v35  ;;  %v777_v26 = vld [vmem:[#allocation7 + $0x238] sm:$0xff]  ;;  %v743_v30 = vld [vmem:[#allocation7 + $0x128] sm:$0xff] }
 0x130   :  { %1520 = vmatmul.f32.vlgmr.msrb.gmra.mxu2 %v704_v31  ;;  %1550 = vmatpush.msra.mxu0 %v725_v37  ;;  %v809_v27 = vld [vmem:[#allocation7 + $0x338] sm:$0xff]  ;;  %v775_v34 = vld [vmem:[#allocation7 + $0x228] sm:$0xff] }
 0x131   :  { %1570 = vmatpush.msra.mxu1 %v757_v38  ;;  %1590 = vmatpush.msra.mxu2 %v789_v39  ;;  %v807_v35 = vld [vmem:[#allocation7 + $0x328] sm:$0xff]  ;;  %v709_v37 = vld [vmem:[#allocation7 + $0x18] sm:$0xff] }
 0x132   :  { %1610 = vmatpush.msra.mxu3 %v821_v44  ;;  %1551 = vmatpush.msra.mxu0 %v723_v47  ;;  %v741_v38 = vld [vmem:[#allocation7 + $0x118] sm:$0xff]  ;;  %v707_v47 = vld [vmem:[#allocation7 + $0x8] sm:$0xff] }
 0x133   :  { %1540 = vmatmul.f32.vlgmr.msrb.gmra.mxu3 %v705_v42  ;;  %1571 = vmatpush.msra.mxu1 %v755_v48  ;;  %v773_v39 = vld [vmem:[#allocation7 + $0x218] sm:$0xff]  ;;  %v739_v48 = vld [vmem:[#allocation7 + $0x108] sm:$0xff] }
 0x134   :  { %1591 = vmatpush.msra.mxu2 %v787_v49  ;;  %1611 = vmatpush.msra.mxu3 %v819_v51  ;;  %v805_v44 = vld [vmem:[#allocation7 + $0x318] sm:$0xff]  ;;  %v771_v49 = vld [vmem:[#allocation7 + $0x208] sm:$0xff] }
 0x135   :  { %1552 = vmatpush.msra.mxu0 %v721_v53  ;;  %1572 = vmatpush.msra.mxu1 %v753_v55  ;;  %v803_v51 = vld [vmem:[#allocation7 + $0x308] sm:$0xff]  ;;  %v865_v53 = vld [vmem:[#allocation7 + $0x4f8] sm:$0xff] }
 0x136   :  { %1592 = vmatpush.msra.mxu2 %v785_v56  ;;  %1612 = vmatpush.msra.mxu3 %v817_v58  ;;  %v897_v55 = vld [vmem:[#allocation7 + $0x5f8] sm:$0xff] }
 0x137   :  { %1553 = vmatpush.msra.mxu0 %v719_v61  ;;  %1573 = vmatpush.msra.mxu1 %v751_v63  ;;  %v929_v56 = vld [vmem:[#allocation7 + $0x6f8] sm:$0xff]  ;;  %v863_v61 = vld [vmem:[#allocation7 + $0x4e8] sm:$0xff] }
 0x138   :  { %1593 = vmatpush.msra.mxu2 %v783_v0  ;;  %1613 = vmatpush.msra.mxu3 %v815_v5  ;;  %v961_v58 = vld [vmem:[#allocation7 + $0x7f8] sm:$0xff]  ;;  %v895_v63 = vld [vmem:[#allocation7 + $0x5e8] sm:$0xff] }
 0x139   :  { %1554 = vmatpush.msra.mxu0 %v717_v8  ;;  %1574 = vmatpush.msra.mxu1 %v749_v9  ;;  %v927_v0 = vld [vmem:[#allocation7 + $0x6e8] sm:$0xff]  ;;  %v857_v8 = vld [vmem:[#allocation7 + $0x4b8] sm:$0xff] }
 0x13a   :  { %1594 = vmatpush.msra.mxu2 %v781_v11  ;;  %1614 = vmatpush.msra.mxu3 %v813_v13  ;;  %v959_v5 = vld [vmem:[#allocation7 + $0x7e8] sm:$0xff]  ;;  %v889_v9 = vld [vmem:[#allocation7 + $0x5b8] sm:$0xff] }
 0x13b   :  { %1555 = vmatpush.msra.mxu0 %v715_v16  ;;  %1575 = vmatpush.msra.mxu1 %v747_v20  ;;  %v921_v11 = vld [vmem:[#allocation7 + $0x6b8] sm:$0xff]  ;;  %v855_v16 = vld [vmem:[#allocation7 + $0x4a8] sm:$0xff] }
 0x13c   :  { %1595 = vmatpush.msra.mxu2 %v779_v40  ;;  %1615 = vmatpush.msra.mxu3 %v811_v22  ;;  %v953_v13 = vld [vmem:[#allocation7 + $0x7b8] sm:$0xff]  ;;  %v887_v20 = vld [vmem:[#allocation7 + $0x5a8] sm:$0xff] }
 0x13d   :  { %1556 = vmatpush.msra.mxu0 %v713_v24  ;;  %1576 = vmatpush.msra.mxu1 %v745_v25  ;;  %v919_v40 = vld [vmem:[#allocation7 + $0x6a8] sm:$0xff]  ;;  %v853_v24 = vld [vmem:[#allocation7 + $0x498] sm:$0xff] }
 0x13e   :  { %1596 = vmatpush.msra.mxu2 %v777_v26  ;;  %1616 = vmatpush.msra.mxu3 %v809_v27  ;;  %v951_v22 = vld [vmem:[#allocation7 + $0x7a8] sm:$0xff]  ;;  %v885_v25 = vld [vmem:[#allocation7 + $0x598] sm:$0xff] }
 0x13f   :  { %1557 = vmatpush.msra.mxu0 %v711_v28  ;;  %1577 = vmatpush.msra.mxu1 %v743_v30  ;;  %v917_v26 = vld [vmem:[#allocation7 + $0x698] sm:$0xff]  ;;  %v851_v28 = vld [vmem:[#allocation7 + $0x488] sm:$0xff] }
 0x140   :  { %1597 = vmatpush.msra.mxu2 %v775_v34  ;;  %1617 = vmatpush.msra.mxu3 %v807_v35  ;;  %v949_v27 = vld [vmem:[#allocation7 + $0x798] sm:$0xff]  ;;  %v883_v30 = vld [vmem:[#allocation7 + $0x588] sm:$0xff] }
 0x141   :  { %1558 = vmatpush.msra.mxu0 %v709_v37  ;;  %1578 = vmatpush.msra.mxu1 %v741_v38  ;;  %v915_v34 = vld [vmem:[#allocation7 + $0x688] sm:$0xff]  ;;  %v849_v37 = vld [vmem:[#allocation7 + $0x478] sm:$0xff] }
 0x142   :  { %1598 = vmatpush.msra.mxu2 %v773_v39  ;;  %1618 = vmatpush.msra.mxu3 %v805_v44  ;;  %v947_v35 = vld [vmem:[#allocation7 + $0x788] sm:$0xff]  ;;  %v881_v38 = vld [vmem:[#allocation7 + $0x578] sm:$0xff] }
 0x143   :  { %1559 = vmatpush.msra.mxu0 %v707_v47  ;;  %1579 = vmatpush.msra.mxu1 %v739_v48  ;;  %v913_v39 = vld [vmem:[#allocation7 + $0x678] sm:$0xff]  ;;  %v847_v47 = vld [vmem:[#allocation7 + $0x468] sm:$0xff] }
 0x144   :  { %1599 = vmatpush.msra.mxu2 %v771_v49  ;;  %1619 = vmatpush.msra.mxu3 %v803_v51  ;;  %v945_v44 = vld [vmem:[#allocation7 + $0x778] sm:$0xff]  ;;  %v879_v48 = vld [vmem:[#allocation7 + $0x568] sm:$0xff] }
 0x145   :  { %1560 = vmatmul.f32.vlgmr.msra.gmra.mxu0 %v690_v14  ;;  %1580 = vmatmul.f32.vlgmr.msra.gmra.mxu1 %v691_v15  ;;  %v893_v14 = vld [vmem:[#allocation7 + $0x5d8] sm:$0xff]  ;;  %v911_v49 = vld [vmem:[#allocation7 + $0x668] sm:$0xff] }
 0x146   :  { %1600 = vmatmul.f32.vlgmr.msra.gmra.mxu2 %v692_v18  ;;  %1620 = vmatmul.f32.vlgmr.msra.gmra.mxu3 %v693_v19  ;;  %v957_v15 = vld [vmem:[#allocation7 + $0x7d8] sm:$0xff]  ;;  %v891_v18 = vld [vmem:[#allocation7 + $0x5c8] sm:$0xff] }
 0x147   :  { %1624 = vmatpush.msrb.mxu0 %v865_v53  ;;  %1644 = vmatpush.msrb.mxu1 %v897_v55  ;;  %v955_v19 = vld [vmem:[#allocation7 + $0x7c8] sm:$0xff]  ;;  %v845_v53 = vld [vmem:[#allocation7 + $0x458] sm:$0xff] }
 0x148   :  { %1664 = vmatpush.msrb.mxu2 %v929_v56  ;;  %1684 = vmatpush.msrb.mxu3 %v961_v58  ;;  %v943_v51 = vld [vmem:[#allocation7 + $0x768] sm:$0xff]  ;;  %v877_v55 = vld [vmem:[#allocation7 + $0x558] sm:$0xff] }
 0x149   :  { %1625 = vmatpush.msrb.mxu0 %v863_v61  ;;  %1645 = vmatpush.msrb.mxu1 %v895_v63  ;;  %v909_v56 = vld [vmem:[#allocation7 + $0x658] sm:$0xff]  ;;  %v843_v61 = vld [vmem:[#allocation7 + $0x448] sm:$0xff] }
 0x14a   :  { %1665 = vmatpush.msrb.mxu2 %v927_v0  ;;  %1685 = vmatpush.msrb.mxu3 %v959_v5  ;;  %v941_v58 = vld [vmem:[#allocation7 + $0x758] sm:$0xff]  ;;  %v875_v63 = vld [vmem:[#allocation7 + $0x548] sm:$0xff] }
 0x14b   :  { %1626 = vmatpush.msrb.mxu0 %v861_v2  ;;  %1646 = vmatpush.msrb.mxu1 %v893_v14  ;;  %v907_v0 = vld [vmem:[#allocation7 + $0x648] sm:$0xff]  ;;  %v841_v2 = vld [vmem:[#allocation7 + $0x438] sm:$0xff] }
 0x14c   :  { %1666 = vmatpush.msrb.mxu2 %v925_v3  ;;  %1686 = vmatpush.msrb.mxu3 %v957_v15  ;;  %v939_v5 = vld [vmem:[#allocation7 + $0x748] sm:$0xff]  ;;  %v873_v14 = vld [vmem:[#allocation7 + $0x538] sm:$0xff] }
 0x14d   :  { %1627 = vmatpush.msrb.mxu0 %v859_v6  ;;  %1647 = vmatpush.msrb.mxu1 %v891_v18  ;;  %v905_v3 = vld [vmem:[#allocation7 + $0x638] sm:$0xff]  ;;  %v839_v6 = vld [vmem:[#allocation7 + $0x428] sm:$0xff] }
 0x14e   :  { %1667 = vmatpush.msrb.mxu2 %v923_v7  ;;  %1687 = vmatpush.msrb.mxu3 %v955_v19  ;;  %v937_v15 = vld [vmem:[#allocation7 + $0x738] sm:$0xff]  ;;  %v871_v18 = vld [vmem:[#allocation7 + $0x528] sm:$0xff] }
 0x14f   :  { %1628 = vmatpush.msrb.mxu0 %v857_v8  ;;  %1648 = vmatpush.msrb.mxu1 %v889_v9  ;;  %v903_v7 = vld [vmem:[#allocation7 + $0x628] sm:$0xff]  ;;  %v837_v8 = vld [vmem:[#allocation7 + $0x418] sm:$0xff] }
 0x150   :  { %1668 = vmatpush.msrb.mxu2 %v921_v11  ;;  %1688 = vmatpush.msrb.mxu3 %v953_v13  ;;  %v935_v19 = vld [vmem:[#allocation7 + $0x728] sm:$0xff]  ;;  %v869_v9 = vld [vmem:[#allocation7 + $0x518] sm:$0xff] }
 0x151   :  { %1629 = vmatpush.msrb.mxu0 %v855_v16  ;;  %1649 = vmatpush.msrb.mxu1 %v887_v20  ;;  %v901_v11 = vld [vmem:[#allocation7 + $0x618] sm:$0xff]  ;;  %v835_v16 = vld [vmem:[#allocation7 + $0x408] sm:$0xff] }
 0x152   :  { %1669 = vmatpush.msrb.mxu2 %v919_v40  ;;  %1689 = vmatpush.msrb.mxu3 %v951_v22  ;;  %v933_v13 = vld [vmem:[#allocation7 + $0x718] sm:$0xff]  ;;  %v867_v20 = vld [vmem:[#allocation7 + $0x508] sm:$0xff] }
 0x153   :  { %1630 = vmatpush.msrb.mxu0 %v853_v24  ;;  %1650 = vmatpush.msrb.mxu1 %v885_v25  ;;  %v899_v40 = vld [vmem:[#allocation7 + $0x608] sm:$0xff]  ;;  %v993_v24 = vld [vmem:[#allocation7 + $0x8f8] sm:$0xff] }
 0x154   :  { %1670 = vmatpush.msrb.mxu2 %v917_v26  ;;  %1690 = vmatpush.msrb.mxu3 %v949_v27  ;;  %v931_v22 = vld [vmem:[#allocation7 + $0x708] sm:$0xff]  ;;  %v1025_v25 = vld [vmem:[#allocation7 + $0x9f8] sm:$0xff] }
 0x155   :  { %1631 = vmatpush.msrb.mxu0 %v851_v28  ;;  %1651 = vmatpush.msrb.mxu1 %v883_v30  ;;  %v1057_v26 = vld [vmem:[#allocation7 + $0xaf8] sm:$0xff]  ;;  %v991_v28 = vld [vmem:[#allocation7 + $0x8e8] sm:$0xff] }
 0x156   :  { %1671 = vmatpush.msrb.mxu2 %v915_v34  ;;  %1691 = vmatpush.msrb.mxu3 %v947_v35  ;;  %v1089_v27 = vld [vmem:[#allocation7 + $0xbf8] sm:$0xff]  ;;  %v1023_v30 = vld [vmem:[#allocation7 + $0x9e8] sm:$0xff] }
 0x157   :  { %1632 = vmatpush.msrb.mxu0 %v849_v37  ;;  %1652 = vmatpush.msrb.mxu1 %v881_v38  ;;  %v1055_v34 = vld [vmem:[#allocation7 + $0xae8] sm:$0xff]  ;;  %v985_v37 = vld [vmem:[#allocation7 + $0x8b8] sm:$0xff] }
 0x158   :  { %1672 = vmatpush.msrb.mxu2 %v913_v39  ;;  %1692 = vmatpush.msrb.mxu3 %v945_v44  ;;  %v1087_v35 = vld [vmem:[#allocation7 + $0xbe8] sm:$0xff]  ;;  %v1017_v38 = vld [vmem:[#allocation7 + $0x9b8] sm:$0xff] }
 0x159   :  { %1633 = vmatpush.msrb.mxu0 %v847_v47  ;;  %1653 = vmatpush.msrb.mxu1 %v879_v48  ;;  %v1049_v39 = vld [vmem:[#allocation7 + $0xab8] sm:$0xff]  ;;  %v983_v47 = vld [vmem:[#allocation7 + $0x8a8] sm:$0xff] }
 0x15a   :  { %1673 = vmatpush.msrb.mxu2 %v911_v49  ;;  %1693 = vmatpush.msrb.mxu3 %v943_v51  ;;  %v1081_v44 = vld [vmem:[#allocation7 + $0xbb8] sm:$0xff]  ;;  %v1015_v48 = vld [vmem:[#allocation7 + $0x9a8] sm:$0xff] }
 0x15b   :  { %1634 = vmatpush.msrb.mxu0 %v845_v53  ;;  %1654 = vmatpush.msrb.mxu1 %v877_v55  ;;  %v1047_v49 = vld [vmem:[#allocation7 + $0xaa8] sm:$0xff]  ;;  %v981_v53 = vld [vmem:[#allocation7 + $0x898] sm:$0xff] }
 0x15c   :  { %1674 = vmatpush.msrb.mxu2 %v909_v56  ;;  %1694 = vmatpush.msrb.mxu3 %v941_v58  ;;  %v1079_v51 = vld [vmem:[#allocation7 + $0xba8] sm:$0xff]  ;;  %v1013_v55 = vld [vmem:[#allocation7 + $0x998] sm:$0xff] }
 0x15d   :  { %1635 = vmatpush.msrb.mxu0 %v843_v61  ;;  %1655 = vmatpush.msrb.mxu1 %v875_v63  ;;  %v1045_v56 = vld [vmem:[#allocation7 + $0xa98] sm:$0xff]  ;;  %v979_v61 = vld [vmem:[#allocation7 + $0x888] sm:$0xff] }
 0x15e   :  { %1675 = vmatpush.msrb.mxu2 %v907_v0  ;;  %1695 = vmatpush.msrb.mxu3 %v939_v5  ;;  %v1077_v58 = vld [vmem:[#allocation7 + $0xb98] sm:$0xff]  ;;  %v1011_v63 = vld [vmem:[#allocation7 + $0x988] sm:$0xff] }
 0x15f   :  { %1636 = vmatpush.msrb.mxu0 %v841_v2  ;;  %1656 = vmatpush.msrb.mxu1 %v873_v14  ;;  %v1043_v0 = vld [vmem:[#allocation7 + $0xa88] sm:$0xff]  ;;  %v977_v2 = vld [vmem:[#allocation7 + $0x878] sm:$0xff] }
 0x160   :  { %1676 = vmatpush.msrb.mxu2 %v905_v3  ;;  %1696 = vmatpush.msrb.mxu3 %v937_v15  ;;  %v1075_v5 = vld [vmem:[#allocation7 + $0xb88] sm:$0xff]  ;;  %v1009_v14 = vld [vmem:[#allocation7 + $0x978] sm:$0xff] }
 0x161   :  { %1637 = vmatpush.msrb.mxu0 %v839_v6  ;;  %1657 = vmatpush.msrb.mxu1 %v871_v18  ;;  %v1041_v3 = vld [vmem:[#allocation7 + $0xa78] sm:$0xff]  ;;  %v975_v6 = vld [vmem:[#allocation7 + $0x868] sm:$0xff] }
 0x162   :  { %1677 = vmatpush.msrb.mxu2 %v903_v7  ;;  %1697 = vmatpush.msrb.mxu3 %v935_v19  ;;  %v1073_v15 = vld [vmem:[#allocation7 + $0xb78] sm:$0xff]  ;;  %v1007_v18 = vld [vmem:[#allocation7 + $0x968] sm:$0xff] }
 0x163   :  { %1638 = vmatpush.msrb.mxu0 %v837_v8  ;;  %1658 = vmatpush.msrb.mxu1 %v869_v9  ;;  %v1039_v7 = vld [vmem:[#allocation7 + $0xa68] sm:$0xff]  ;;  %v973_v8 = vld [vmem:[#allocation7 + $0x858] sm:$0xff] }
 0x164   :  { %1678 = vmatpush.msrb.mxu2 %v901_v11  ;;  %1698 = vmatpush.msrb.mxu3 %v933_v13  ;;  %v1071_v19 = vld [vmem:[#allocation7 + $0xb68] sm:$0xff]  ;;  %v1005_v9 = vld [vmem:[#allocation7 + $0x958] sm:$0xff] }
 0x165   :  { %1639 = vmatpush.msrb.mxu0 %v835_v16  ;;  %1659 = vmatpush.msrb.mxu1 %v867_v20  ;;  %v1037_v11 = vld [vmem:[#allocation7 + $0xa58] sm:$0xff]  ;;  %v971_v16 = vld [vmem:[#allocation7 + $0x848] sm:$0xff] }
 0x166   :  { %1679 = vmatpush.msrb.mxu2 %v899_v40  ;;  %1699 = vmatpush.msrb.mxu3 %v931_v22  ;;  %v1069_v13 = vld [vmem:[#allocation7 + $0xb58] sm:$0xff]  ;;  %v1003_v20 = vld [vmem:[#allocation7 + $0x948] sm:$0xff] }
 0x167   :  { %1640 = vmatmul.f32.vlgmr.msrb.gmra.mxu0 %v694_v50  ;;  %1660 = vmatmul.f32.vlgmr.msrb.gmra.mxu1 %v695_v54  ;;  %v1021_v50 = vld [vmem:[#allocation7 + $0x9d8] sm:$0xff]  ;;  %v1035_v40 = vld [vmem:[#allocation7 + $0xa48] sm:$0xff] }
 0x168   :  { %1680 = vmatmul.f32.vlgmr.msrb.gmra.mxu2 %v696_v57  ;;  %1700 = vmatmul.f32.vlgmr.msrb.gmra.mxu3 %v697_v62  ;;  %v1085_v54 = vld [vmem:[#allocation7 + $0xbd8] sm:$0xff]  ;;  %v1019_v57 = vld [vmem:[#allocation7 + $0x9c8] sm:$0xff] }
 0x169   :  { %1704 = vmatpush.msra.mxu0 %v993_v24  ;;  %1724 = vmatpush.msra.mxu1 %v1025_v25  ;;  %v1083_v62 = vld [vmem:[#allocation7 + $0xbc8] sm:$0xff]  ;;  %v969_v24 = vld [vmem:[#allocation7 + $0x838] sm:$0xff] }
 0x16a   :  { %1744 = vmatpush.msra.mxu2 %v1057_v26  ;;  %1764 = vmatpush.msra.mxu3 %v1089_v27  ;;  %v1067_v22 = vld [vmem:[#allocation7 + $0xb48] sm:$0xff]  ;;  %v1001_v25 = vld [vmem:[#allocation7 + $0x938] sm:$0xff]  ;;  %v2202_v26 = vld [vmem:[#allocation8 + $0x10] sm:$0x3] }
 0x16b   :  { %1705 = vmatpush.msra.mxu0 %v991_v28  ;;  %1725 = vmatpush.msra.mxu1 %v1023_v30  ;;  %v1033_v27 = vld [vmem:[#allocation7 + $0xa38] sm:$0xff]  ;;  %v967_v30 = vld [vmem:[#allocation7 + $0x828] sm:$0xff]  ;;  %v1221_v52 = vperm.slane %v2202_v26, 1 }
 0x16c   :  { %1745 = vmatpush.msra.mxu2 %v1055_v34  ;;  %1765 = vmatpush.msra.mxu3 %v1087_v35  ;;  %v1065_v28 = vld [vmem:[#allocation7 + $0xb38] sm:$0xff]  ;;  %v999_v34 = vld [vmem:[#allocation7 + $0x928] sm:$0xff] }
 0x16d   :  { %1706 = vmatpush.msra.mxu0 %v989_v36  ;;  %1726 = vmatpush.msra.mxu1 %v1021_v50  ;;  %v1031_v35 = vld [vmem:[#allocation7 + $0xa28] sm:$0xff]  ;;  %v1220_v50 = vperm.slane %v2202_v26, 0 }
 0x16e   :  { %1746 = vmatpush.msra.mxu2 %v1053_v43  ;;  %1766 = vmatpush.msra.mxu3 %v1085_v54  ;;  %v1063_v36 = vld [vmem:[#allocation7 + $0xb28] sm:$0xff]  ;;  %v965_v43 = vld [vmem:[#allocation7 + $0x818] sm:$0xff] }
 0x16f   :  { %1707 = vmatpush.msra.mxu0 %v987_v46  ;;  %1727 = vmatpush.msra.mxu1 %v1019_v57  ;;  %v997_v54 = vld [vmem:[#allocation7 + $0x918] sm:$0xff]  ;;  %v1241_v46 = vpop.f32.mrf.mxu0 }
 0x170   :  { %1747 = vmatpush.msra.mxu2 %v1051_v45  ;;  %1767 = vmatpush.msra.mxu3 %v1083_v62  ;;  %v1029_v57 = vld [vmem:[#allocation7 + $0xa18] sm:$0xff]  ;;  %v963_v62 = vld [vmem:[#allocation7 + $0x808] sm:$0xff] }
 0x171   :  { %1708 = vmatpush.msra.mxu0 %v985_v37  ;;  %1728 = vmatpush.msra.mxu1 %v1017_v38  ;;  %v1061_v45 = vld [vmem:[#allocation7 + $0xb18] sm:$0xff]  ;;  %v995_v37 = vld [vmem:[#allocation7 + $0x908] sm:$0xff] }
 0x172   :  { %1748 = vmatpush.msra.mxu2 %v1049_v39  ;;  %1768 = vmatpush.msra.mxu3 %v1081_v44  ;;  %v1027_v38 = vld [vmem:[#allocation7 + $0xa08] sm:$0xff]  ;;  %v1242_v44 = vadd.f32 %v1241_v46, %v1220_v50  ;;  %v1169_v50 = vld [vmem:[#allocation7 + $0xe78] sm:$0xff] }
 0x173   :  { %1709 = vmatpush.msra.mxu0 %v983_v47  ;;  %1729 = vmatpush.msra.mxu1 %v1015_v48  ;;  %v1059_v39 = vld [vmem:[#allocation7 + $0xb08] sm:$0xff]  ;;  %v1261_v47 = vpop.f32.mrf.mxu1  ;;  %v1121_v48 = vld [vmem:[#allocation7 + $0xcf8] sm:$0xff] }
 0x174   :  { %1749 = vmatpush.msra.mxu2 %v1047_v49  ;;  %1769 = vmatpush.msra.mxu3 %v1079_v51  ;;  %v1153_v49 = vld [vmem:[#allocation7 + $0xdf8] sm:$0xff]  ;;  %v1103_v46 = vld [vmem:[#allocation7 + $0xc68] sm:$0xff] }
 0x175   :  { %1710 = vmatpush.msra.mxu0 %v981_v53  ;;  %1730 = vmatpush.msra.mxu1 %v1013_v55  ;;  %v1185_v51 = vld [vmem:[#allocation7 + $0xef8] sm:$0xff]  ;;  %v1262_v55 = vadd.f32 %v1261_v47, %v1242_v44 }
 0x176   :  { %1750 = vmatpush.msra.mxu2 %v1045_v56  ;;  %1770 = vmatpush.msra.mxu3 %v1077_v58  ;;  %v1217_v53 = vld [vmem:[#allocation7 + $0xff8] sm:$0xff]  ;;  %v1119_v56 = vld [vmem:[#allocation7 + $0xce8] sm:$0xff] }
 0x177   :  { %1711 = vmatpush.msra.mxu0 %v979_v61  ;;  %1731 = vmatpush.msra.mxu1 %v1011_v63  ;;  %v1151_v58 = vld [vmem:[#allocation7 + $0xde8] sm:$0xff]  ;;  %v1281_v61 = vpop.f32.mrf.mxu2  ;;  %v1165_v47 = vld [vmem:[#allocation7 + $0xe58] sm:$0xff] }
 0x178   :  { %1751 = vmatpush.msra.mxu2 %v1043_v0  ;;  %1771 = vmatpush.msra.mxu3 %v1075_v5  ;;  %v1183_v63 = vld [vmem:[#allocation7 + $0xee8] sm:$0xff]  ;;  %v1213_v0 = vld [vmem:[#allocation7 + $0xfd8] sm:$0xff]  ;;  %v1282_v23 = vadd.f32 %v1281_v61, %v1262_v55 }
 0x179   :  { %1712 = vmatpush.msra.mxu0 %v977_v2  ;;  %1732 = vmatpush.msra.mxu1 %v1009_v14  ;;  %v1179_v5 = vld [vmem:[#allocation7 + $0xec8] sm:$0xff]  ;;  %v1113_v14 = vld [vmem:[#allocation7 + $0xcb8] sm:$0xff] }
 0x17a   :  { %1752 = vmatpush.msra.mxu2 %v1041_v3  ;;  %1772 = vmatpush.msra.mxu3 %v1073_v15  ;;  %v1211_v2 = vld [vmem:[#allocation7 + $0xfc8] sm:$0xff]  ;;  %v1145_v3 = vld [vmem:[#allocation7 + $0xdb8] sm:$0xff] }
 0x17b   :  { %1713 = vmatpush.msra.mxu0 %v975_v6  ;;  %1733 = vmatpush.msra.mxu1 %v1007_v18  ;;  %v1177_v15 = vld [vmem:[#allocation7 + $0xeb8] sm:$0xff]  ;;  %v1163_v55 = vld [vmem:[#allocation7 + $0xe48] sm:$0xff] }
 0x17c   :  { %1753 = vmatpush.msra.mxu2 %v1039_v7  ;;  %1773 = vmatpush.msra.mxu3 %v1071_v19  ;;  %v1209_v6 = vld [vmem:[#allocation7 + $0xfb8] sm:$0xff]  ;;  %v1111_v7 = vld [vmem:[#allocation7 + $0xca8] sm:$0xff] }
 0x17d   :  { %1714 = vmatpush.msra.mxu0 %v973_v8  ;;  %1734 = vmatpush.msra.mxu1 %v1005_v9  ;;  %v1143_v19 = vld [vmem:[#allocation7 + $0xda8] sm:$0xff]  ;;  %v1321_v8 = vpop.f32.mrf.mxu0  ;;  %v1097_v61 = vld [vmem:[#allocation7 + $0xc38] sm:$0xff] }
 0x17e   :  { %1754 = vmatpush.msra.mxu2 %v1037_v11  ;;  %1774 = vmatpush.msra.mxu3 %v1069_v13  ;;  %v1175_v9 = vld [vmem:[#allocation7 + $0xea8] sm:$0xff]  ;;  %v1109_v13 = vld [vmem:[#allocation7 + $0xc98] sm:$0xff] }
 0x17f   :  { %1715 = vmatpush.msra.mxu0 %v971_v16  ;;  %1735 = vmatpush.msra.mxu1 %v1003_v20  ;;  %v1207_v11 = vld [vmem:[#allocation7 + $0xfa8] sm:$0xff]  ;;  %v1141_v16 = vld [vmem:[#allocation7 + $0xd98] sm:$0xff] }
 0x180   :  { %1755 = vmatpush.msra.mxu2 %v1035_v40  ;;  %1775 = vmatpush.msra.mxu3 %v1067_v22  ;;  %v1173_v20 = vld [vmem:[#allocation7 + $0xe98] sm:$0xff] }
 0x181   :  { %1716 = vmatpush.msra.mxu0 %v969_v24  ;;  %1736 = vmatpush.msra.mxu1 %v1001_v25  ;;  %v1205_v40 = vld [vmem:[#allocation7 + $0xf98] sm:$0xff]  ;;  %v1107_v24 = vld [vmem:[#allocation7 + $0xc88] sm:$0xff] }
 0x182   :  { %1756 = vmatpush.msra.mxu2 %v1033_v27  ;;  %1776 = vmatpush.msra.mxu3 %v1065_v28  ;;  %v1139_v25 = vld [vmem:[#allocation7 + $0xd88] sm:$0xff]  ;;  %v1341_v27 = vpop.f32.mrf.mxu1 }
 0x183   :  { %1717 = vmatpush.msra.mxu0 %v967_v30  ;;  %1737 = vmatpush.msra.mxu1 %v999_v34  ;;  %v1171_v28 = vld [vmem:[#allocation7 + $0xe88] sm:$0xff]  ;;  %v1105_v34 = vld [vmem:[#allocation7 + $0xc78] sm:$0xff] }
 0x184   :  { %1757 = vmatpush.msra.mxu2 %v1031_v35  ;;  %1777 = vmatpush.msra.mxu3 %v1063_v36  ;;  %v1203_v30 = vld [vmem:[#allocation7 + $0xf88] sm:$0xff]  ;;  %v1137_v35 = vld [vmem:[#allocation7 + $0xd78] sm:$0xff]  ;;  %v1361_v36 = vpop.f32.mrf.mxu2 }
 0x185   :  { %1718 = vmatpush.msra.mxu0 %v965_v43  ;;  %1738 = vmatpush.msra.mxu1 %v997_v54  ;;  %v1201_v43 = vld [vmem:[#allocation7 + $0xf78] sm:$0xff] }
 0x186   :  { %1758 = vmatpush.msra.mxu2 %v1029_v57  ;;  %1778 = vmatpush.msra.mxu3 %v1061_v45  ;;  %v1135_v57 = vld [vmem:[#allocation7 + $0xd68] sm:$0xff] }
 0x187   :  { %1719 = vmatpush.msra.mxu0 %v963_v62  ;;  %1739 = vmatpush.msra.mxu1 %v995_v37  ;;  %v1167_v45 = vld [vmem:[#allocation7 + $0xe68] sm:$0xff] }
 0x188   :  { %1759 = vmatpush.msra.mxu2 %v1027_v38  ;;  %1779 = vmatpush.msra.mxu3 %v1059_v39  ;;  %v1199_v62 = vld [vmem:[#allocation7 + $0xf68] sm:$0xff]  ;;  %v1101_v38 = vld [vmem:[#allocation7 + $0xc58] sm:$0xff] }
 0x189   :  { %1720 = vmatmul.f32.vlgmr.msra.gmra.mxu0 %v698_v10  ;;  %1740 = vmatmul.f32.vlgmr.msra.gmra.mxu1 %v699_v17  ;;  %v1149_v10 = vld [vmem:[#allocation7 + $0xdd8] sm:$0xff] }
 0x18a   :  { %1760 = vmatmul.f32.vlgmr.msra.gmra.mxu2 %v700_v32  ;;  %1780 = vmatmul.f32.vlgmr.msra.gmra.mxu3 %v701_v41  ;;  %v1181_v17 = vld [vmem:[#allocation7 + $0xed8] sm:$0xff]  ;;  %v1147_v32 = vld [vmem:[#allocation7 + $0xdc8] sm:$0xff]  ;;  %v1301_v41 = vpop.f32.mrf.mxu3 }
 0x18b   :  { %1784 = vmatpush.msrb.mxu0 %v1121_v48  ;;  %1804 = vmatpush.msrb.mxu1 %v1153_v49  ;;  %v1302_v18 = vadd.f32 %v1301_v41, %v1282_v23  ;;  %v1133_v39 = vld [vmem:[#allocation7 + $0xd58] sm:$0xff]  ;;  %v1099_v49 = vld [vmem:[#allocation7 + $0xc48] sm:$0xff]  ;;  %v1421_v23 = vpop.f32.mrf.mxu1 }
 0x18c   :  { %1824 = vmatpush.msrb.mxu2 %v1185_v51  ;;  %1844 = vmatpush.msrb.mxu3 %v1217_v53  ;;  %v1197_v48 = vld [vmem:[#allocation7 + $0xf58] sm:$0xff]  ;;  %v1131_v51 = vld [vmem:[#allocation7 + $0xd48] sm:$0xff]  ;;  %v1401_v53 = vpop.f32.mrf.mxu0 }
 0x18d   :  { %1785 = vmatpush.msrb.mxu0 %v1119_v56  ;;  %1805 = vmatpush.msrb.mxu1 %v1151_v58  ;;  %v1322_v22 = vadd.f32 %v1321_v8, %v1302_v18  ;;  %v1195_v56 = vld [vmem:[#allocation7 + $0xf48] sm:$0xff]  ;;  %v1093_v41 = vld [vmem:[#allocation7 + $0xc18] sm:$0xff] }
 0x18e   :  { %1825 = vmatpush.msrb.mxu2 %v1183_v63  ;;  %1845 = vmatpush.msrb.mxu3 %v1215_v60  ;;  %v1129_v63 = vld [vmem:[#allocation7 + $0xd38] sm:$0xff]  ;;  %v1123_v18 = vld [vmem:[#allocation7 + $0xd08] sm:$0xff] }
 0x18f   :  { %1786 = vmatpush.msrb.mxu0 %v1117_v4  ;;  %1806 = vmatpush.msrb.mxu1 %v1149_v10  ;;  %v1342_v54 = vadd.f32 %v1341_v27, %v1322_v22  ;;  %v1161_v60 = vld [vmem:[#allocation7 + $0xe38] sm:$0xff] }
 0x190   :  { %1826 = vmatpush.msrb.mxu2 %v1181_v17  ;;  %1846 = vmatpush.msrb.mxu3 %v1213_v0  ;;  %v1193_v4 = vld [vmem:[#allocation7 + $0xf38] sm:$0xff]  ;;  %v1095_v17 = vld [vmem:[#allocation7 + $0xc28] sm:$0xff] }
 0x191   :  { %1787 = vmatpush.msrb.mxu0 %v1115_v29  ;;  %1807 = vmatpush.msrb.mxu1 %v1147_v32  ;;  %v1362_v37 = vadd.f32 %v1361_v36, %v1342_v54  ;;  %v1127_v0 = vld [vmem:[#allocation7 + $0xd28] sm:$0xff] }
 0x192   :  { %1827 = vmatpush.msrb.mxu2 %v1179_v5  ;;  %1847 = vmatpush.msrb.mxu3 %v1211_v2  ;;  %v1381_v44 = vpop.f32.mrf.mxu3  ;;  %v1159_v29 = vld [vmem:[#allocation7 + $0xe28] sm:$0xff]  ;;  %v1125_v5 = vld [vmem:[#allocation7 + $0xd18] sm:$0xff]  ;;  %v1441_v2 = vpop.f32.mrf.mxu2 }
 0x193   :  { %1788 = vmatpush.msrb.mxu0 %v1113_v14  ;;  %1808 = vmatpush.msrb.mxu1 %v1145_v3  ;;  %v1382_v58 = vadd.f32 %v1381_v44, %v1362_v37  ;;  %v1191_v32 = vld [vmem:[#allocation7 + $0xf28] sm:$0xff]  ;;  %v1157_v14 = vld [vmem:[#allocation7 + $0xe18] sm:$0xff] }
 0x194   :  { %1828 = vmatpush.msrb.mxu2 %v1177_v15  ;;  %1848 = vmatpush.msrb.mxu3 %v1209_v6  ;;  %v1189_v3 = vld [vmem:[#allocation7 + $0xf18] sm:$0xff]  ;;  %v1091_v6 = vld [vmem:[#allocation7 + $0xc08] sm:$0xff] }
 0x195   :  { %1789 = vmatpush.msrb.mxu0 %v1111_v7  ;;  %1809 = vmatpush.msrb.mxu1 %v1143_v19  ;;  %v1402_v10 = vadd.f32 %v1401_v53, %v1382_v58  ;;  %v1155_v7 = vld [vmem:[#allocation7 + $0xe08] sm:$0xff] }
 0x196   :  { %1829 = vmatpush.msrb.mxu2 %v1175_v9  ;;  %1849 = vmatpush.msrb.mxu3 %v1207_v11  ;;  %v1187_v19 = vld [vmem:[#allocation7 + $0xf08] sm:$0xff] }
 0x197   :  { %1790 = vmatpush.msrb.mxu0 %v1109_v13  ;;  %1810 = vmatpush.msrb.mxu1 %v1141_v16  ;;  %v1422_v15 = vadd.f32 %v1421_v23, %v1402_v10 }
 0x198   :  { %1830 = vmatpush.msrb.mxu2 %v1173_v20  ;;  %1850 = vmatpush.msrb.mxu3 %v1205_v40 }
 0x199   :  { %1791 = vmatpush.msrb.mxu0 %v1107_v24  ;;  %1811 = vmatpush.msrb.mxu1 %v1139_v25  ;;  %v1442_v8 = vadd.f32 %v1441_v2, %v1422_v15 }
 0x19a   :  { %1831 = vmatpush.msrb.mxu2 %v1171_v28  ;;  %1851 = vmatpush.msrb.mxu3 %v1203_v30  ;;  %v1461_v9 = vpop.f32.mrf.mxu3 }
 0x19b   :  { %1792 = vmatpush.msrb.mxu0 %v1105_v34  ;;  %1812 = vmatpush.msrb.mxu1 %v1137_v35  ;;  %v1462_v13 = vadd.f32 %v1461_v9, %v1442_v8 }
 0x19c   :  { %1832 = vmatpush.msrb.mxu2 %v1169_v50  ;;  %1852 = vmatpush.msrb.mxu3 %v1201_v43 }
 0x19d   :  { %1793 = vmatpush.msrb.mxu0 %v1103_v46  ;;  %1813 = vmatpush.msrb.mxu1 %v1135_v57 }
 0x19e   :  { %1833 = vmatpush.msrb.mxu2 %v1167_v45  ;;  %1853 = vmatpush.msrb.mxu3 %v1199_v62 }
 0x19f   :  { %1794 = vmatpush.msrb.mxu0 %v1101_v38  ;;  %1814 = vmatpush.msrb.mxu1 %v1133_v39 }
 0x1a0   :  { %1834 = vmatpush.msrb.mxu2 %v1165_v47  ;;  %1854 = vmatpush.msrb.mxu3 %v1197_v48 }
 0x1a1   :  { %1795 = vmatpush.msrb.mxu0 %v1099_v49  ;;  %1815 = vmatpush.msrb.mxu1 %v1131_v51 }
 0x1a2   :  { %1835 = vmatpush.msrb.mxu2 %v1163_v55  ;;  %1855 = vmatpush.msrb.mxu3 %v1195_v56 }
 0x1a3   :  { %1796 = vmatpush.msrb.mxu0 %v1097_v61  ;;  %1816 = vmatpush.msrb.mxu1 %v1129_v63 }
 0x1a4   :  { %1836 = vmatpush.msrb.mxu2 %v1161_v60  ;;  %1856 = vmatpush.msrb.mxu3 %v1193_v4 }
 0x1a5   :  { %1797 = vmatpush.msrb.mxu0 %v1095_v17  ;;  %1817 = vmatpush.msrb.mxu1 %v1127_v0 }
 0x1a6   :  { %1837 = vmatpush.msrb.mxu2 %v1159_v29  ;;  %1857 = vmatpush.msrb.mxu3 %v1191_v32  ;;  %v1481_v11 = vpop.f32.mrf.mxu0 }
 0x1a7   :  { %1798 = vmatpush.msrb.mxu0 %v1093_v41  ;;  %1818 = vmatpush.msrb.mxu1 %v1125_v5  ;;  %v1482_v16 = vadd.f32 %v1481_v11, %v1462_v13 }
 0x1a8   :  { %1838 = vmatpush.msrb.mxu2 %v1157_v14  ;;  %1858 = vmatpush.msrb.mxu3 %v1189_v3  ;;  %v1501_v20 = vpop.f32.mrf.mxu1 }
 0x1a9   :  { %1799 = vmatpush.msrb.mxu0 %v1091_v6  ;;  %1819 = vmatpush.msrb.mxu1 %v1123_v18  ;;  %v1502_v40 = vadd.f32 %v1501_v20, %v1482_v16 }
 0x1aa   :  { %1839 = vmatpush.msrb.mxu2 %v1155_v7  ;;  %1859 = vmatpush.msrb.mxu3 %v1187_v19 }
 0x1ab   :  { %1800 = vmatmul.f32.vlgmr.msrb.gmra.mxu0 %v702_v1  ;;  %1820 = vmatmul.f32.vlgmr.msrb.gmra.mxu1 %v703_v12 }
 0x1ac   :  { %1840 = vmatmul.f32.vlgmr.msrb.gmra.mxu2 %v704_v31  ;;  %1860 = vmatmul.f32.vlgmr.msrb.gmra.mxu3 %v705_v42 }
 0x1b3   :  { %v1521_v22 = vpop.f32.mrf.mxu2 }
 0x1b4   :  { %v1522_v24 = vadd.f32 %v1521_v22, %v1502_v40 }
 0x1b6   :  { %v1541_v25 = vpop.f32.mrf.mxu3 }
 0x1b7   :  { %v1542_v27 = vadd.f32 %v1541_v25, %v1522_v24 }
 0x1b9   :  { %1864 = vst [vmem:[#allocation10] sm:$0xff] %v1542_v27 }
 0x1c2   :  { %v1561_v59 = vpop.f32.mrf.mxu0  ;;  %v1581_v12 = vpop.f32.mrf.mxu1 }
 0x1c3   :  { %v1562_v1 = vadd.f32 %v1561_v59, %v1221_v52 }
 0x1c5   :  { %v1582_v30 = vadd.f32 %v1581_v12, %v1562_v1 }
 0x1c9   :  { %v1601_v28 = vpop.f32.mrf.mxu2  ;;  %v1621_v31 = vpop.f32.mrf.mxu3 }
 0x1ca   :  { %v1602_v21 = vadd.f32 %v1601_v28, %v1582_v30 }
 0x1cc   :  { %v1622_v33 = vadd.f32 %v1621_v31, %v1602_v21 }
 0x1e4   :  { %v1641_v34 = vpop.f32.mrf.mxu0  ;;  %v1661_v35 = vpop.f32.mrf.mxu1 }
 0x1e5   :  { %v1642_v42 = vadd.f32 %v1641_v34, %v1622_v33 }
 0x1e7   :  { %v1662_v50 = vadd.f32 %v1661_v35, %v1642_v42 }
 0x1eb   :  { %v1681_v36 = vpop.f32.mrf.mxu2  ;;  %v1701_v54 = vpop.f32.mrf.mxu3 }
 0x1ec   :  { %v1682_v43 = vadd.f32 %v1681_v36, %v1662_v50 }
 0x1ee   :  { %v1702_v57 = vadd.f32 %v1701_v54, %v1682_v43 }
 0x206   :  { %v1721_v46 = vpop.f32.mrf.mxu0  ;;  %v1741_v62 = vpop.f32.mrf.mxu1 }
 0x207   :  { %v1722_v45 = vadd.f32 %v1721_v46, %v1702_v57 }
 0x209   :  { %v1742_v37 = vadd.f32 %v1741_v62, %v1722_v45 }
 0x20d   :  { %v1761_v26 = vpop.f32.mrf.mxu2  ;;  %v1781_v39 = vpop.f32.mrf.mxu3 }
 0x20e   :  { %v1762_v38 = vadd.f32 %v1761_v26, %v1742_v37 }
 0x210   :  { %v1782_v44 = vadd.f32 %v1781_v39, %v1762_v38 }
 0x228   :  { %v1801_v47 = vpop.f32.mrf.mxu0  ;;  %v1821_v49 = vpop.f32.mrf.mxu1 }
 0x229   :  { %v1802_v48 = vadd.f32 %v1801_v47, %v1782_v44 }
 0x22b   :  { %v1822_v51 = vadd.f32 %v1821_v49, %v1802_v48 }
 0x22f   :  { %v1841_v53 = vpop.f32.mrf.mxu2  ;;  %v1861_v56 = vpop.f32.mrf.mxu3 }
 0x230   :  { %v1842_v55 = vadd.f32 %v1841_v53, %v1822_v51 }
 0x232   :  { %v1862_v58 = vadd.f32 %v1861_v56, %v1842_v55 }
 0x234   :  { %1865 = vst [vmem:[#allocation10 + $0x8] sm:$0xff] %v1862_v58 }
 0x235   :  { %1876 = dma.vmem_to_hbm [thread:$0]  %s1872_s3, 256, %s1874_s13, [#allocation4]  }
 0x236   :  { %2020 = dma.done.wait [#allocation4], 256  }
 0x237   :  { %2021 = vsyncadd [#allocation4], 4294967040 }
 0x238   :  { %1881 = vsyncpa [#allocation3], 1 }
 0x239   :  { %1882 = vsyncpa [#allocation6], 1 }
 0x23a   :  { %1883 = vsyncpa [#allocation9], 1 }
 0x23b   :  { %1884 = vsyncpa [#allocation4], 1 }

</bundles_post_ra>
